<compile_context>
chip_gen: v7x
topology: tpu7x:2x2x1
jax: 0.10.0
libtpu: 0.0.40
codegen_flags: <defaults>
</compile_context>

<pallas_src>
import jax
import jax.numpy as jnp
from jax import lax
from jax.experimental import pallas as pl
from jax.experimental.pallas import tpu as pltpu


def bilstm_kernel(x_ref,      # (1, T, 2I) bf16   row t = [x_t | x_{T-1-t}]
                  wih_ref,    # (2I, 8H)   bf16   direction-blocked input proj
                  bcat_ref,   # (1, 8H)    f32    fused biases, both directions
                  whh_ref,    # (2H, 8H)   bf16   block-diag recurrent weights
                  w1_ref,     # (2H, 50)   bf16   dense1
                  b1_ref,     # (1, 50)    f32
                  w2t_ref,    # (2, 50)    bf16   dense2, pre-transposed
                  b2t_ref,    # (2, 1)     f32
                  out_ref,    # (1, 2, T)  f32    log-probs, classes x time
                  gate_ref,   # scratch (T, 8H) f32  input-side gate pre-acts
                  hseq_ref):  # scratch (T, 2H) f32  [h_fwd(t) | h_bwd(t)]
    T = gate_ref.shape[0]
    H2 = hseq_ref.shape[1]          # 2H  (fwd + bwd hidden width)
    H = H2 // 2

    # ---- Hoisted input projection for BOTH directions: one bf16 MXU matmul.
    # Gate layout per row: [i_f,i_b | f_f,f_b | g_f,g_b | o_f,o_b], each H wide;
    # the bwd sub-blocks already correspond to input time T-1-t (wrapper packed
    # the time-reversed x on the feature axis).
    gate_ref[...] = (jnp.dot(x_ref[0], wih_ref[...],
                             preferred_element_type=jnp.float32)
                     + bcat_ref[...])

    whh = whh_ref[...]

    def step(t, carry):
        h, c = carry                                   # (1, 2H) f32  [fwd|bwd]
        # Single fused MXU push per step (block-diagonal W_hh for both dirs);
        # only this dot sits on the serial dependency chain.
        g = gate_ref[pl.ds(t, 1), :] + jnp.dot(
            h.astype(jnp.bfloat16), whh, preferred_element_type=jnp.float32)
        # Gate order (i, f, g, o) per 2H block; elementwise math kept in f32.
        i_g = jax.nn.sigmoid(g[:, 0 * H2:1 * H2])
        f_g = jax.nn.sigmoid(g[:, 1 * H2:2 * H2])
        g_g = jnp.tanh(g[:, 2 * H2:3 * H2])
        o_g = jax.nn.sigmoid(g[:, 3 * H2:4 * H2])
        c_new = f_g * c + i_g * g_g
        h_new = o_g * jnp.tanh(c_new)
        # fwd half belongs to time t, bwd half to time T-1-t.
        hseq_ref[pl.ds(t, 1), pl.ds(0, H)] = h_new[:, :H]
        hseq_ref[pl.ds(T - 1 - t, 1), pl.ds(H, H)] = h_new[:, H:]
        return h_new, c_new

    zeros = jnp.zeros((1, H2), jnp.float32)
    lax.fori_loop(0, T, step, (zeros, zeros), unroll=8)   # bounded unroll

    # ---- Dense head: 2-D operands, bf16 MXU matmuls, f32 accumulation.
    hs = hseq_ref[...].astype(jnp.bfloat16)                           # (T, 2H)
    z1 = jnp.dot(hs, w1_ref[...],
                 preferred_element_type=jnp.float32) + b1_ref[...]    # (T, 50)
    z1 = jnp.maximum(z1, 0.0)                                         # ReLU
    # logits transposed to (classes, T): contract the feature axis of both
    # operands ("A @ B^T" form) so TIME lands on lanes -> lane-dense store and
    # a lane reduce for the time softmax.
    logits_ct = lax.dot_general(
        w2t_ref[...], z1.astype(jnp.bfloat16),
        dimension_numbers=(((1,), (1,)), ((), ())),
        preferred_element_type=jnp.float32) + b2t_ref[...]            # (2, T)

    # LogSoftmax over dim=1 of the (B, T, 2) batch-first output == over TIME,
    # which is the last (lane) axis here.
    m = jnp.max(logits_ct, axis=1, keepdims=True)
    zc = logits_ct - m
    lse = jnp.log(jnp.sum(jnp.exp(zc), axis=1, keepdims=True))
    out_ref[0] = zc - lse


def _interleave_gates(a_f, a_b, H):
    """(..., 4H) fwd/bwd (gate order i,f,g,o) -> (..., 8H) laid out
    [i_f,i_b | f_f,f_b | g_f,g_b | o_f,o_b] (each sub-block H wide)."""
    parts = []
    for gi in range(4):
        parts.append(a_f[..., gi * H:(gi + 1) * H])
        parts.append(a_b[..., gi * H:(gi + 1) * H])
    return jnp.concatenate(parts, axis=-1)


def bilstm_forward(x, params):
    """x: (B, T, I) float32. Returns (B, T, 2) float32 (log-softmax over time)."""
    B, T, I = x.shape
    H = params["whh_f"].shape[0]
    bf16 = jnp.bfloat16

    # ---- Operand packing: ALL layout work done here, outside the kernel. ----
    # Pack x and time-reversed x on the feature axis so the in-kernel projection
    # produces fwd(t) and bwd(T-1-t) gates on the same row.
    xx = jnp.concatenate([x, x[:, ::-1, :]], axis=-1).astype(bf16)    # (B,T,2I)

    zi = jnp.zeros_like(params["wih_f"])
    wih2 = jnp.concatenate([_interleave_gates(params["wih_f"], zi, H),
                            _interleave_gates(zi, params["wih_b"], H)],
                           axis=0).astype(bf16)                       # (2I,8H)
    zh = jnp.zeros_like(params["whh_f"])
    whh2 = jnp.concatenate([_interleave_gates(params["whh_f"], zh, H),
                            _interleave_gates(zh, params["whh_b"], H)],
                           axis=0).astype(bf16)                       # (2H,8H)
    bcat = _interleave_gates(params["b_f"], params["b_b"], H)         # (1,8H) f32
    w1 = params["w1"].astype(bf16)                                    # (2H,50)
    b1 = params["b1"]                                                 # (1,50) f32
    w2t = params["w2"].T.astype(bf16)                                 # (2,50)
    b2t = params["b2"].reshape(2, 1)                                  # (2,1) f32

    flops = int(2 * B * T * (2 * I * 8 * H + 2 * H * 8 * H + 2 * H * 50 + 50 * 2))
    transcendentals = int(B * T * 10 * H + B * 2 * T)
    bytes_accessed = int(2 * (B * T * 2 * I + 2 * I * 8 * H + 2 * H * 8 * H
                              + 2 * H * 50 + 2 * 50)
                         + 4 * (8 * H + 50 + 2 + B * 2 * T))
    cost = pl.CostEstimate(flops=flops, transcendentals=transcendentals,
                           bytes_accessed=bytes_accessed)

    def full_spec(shape):
        return pl.BlockSpec(shape, lambda b: (0,) * len(shape))

    out_ct = pl.pallas_call(
        bilstm_kernel,
        out_shape=jax.ShapeDtypeStruct((B, 2, T), jnp.float32),
        grid_spec=pltpu.PrefetchScalarGridSpec(
            num_scalar_prefetch=0,
            grid=(B,),                                 # batch tiles (tile = 1)
            in_specs=[pl.BlockSpec((1, T, 2 * I), lambda b: (b, 0, 0)),
                      full_spec(wih2.shape), full_spec(bcat.shape),
                      full_spec(whh2.shape), full_spec(w1.shape),
                      full_spec(b1.shape), full_spec(w2t.shape),
                      full_spec(b2t.shape)],
            out_specs=pl.BlockSpec((1, 2, T), lambda b: (b, 0, 0)),
            scratch_shapes=[pltpu.VMEM((T, 8 * H), jnp.float32),
                            pltpu.VMEM((T, 2 * H), jnp.float32)]),
        compiler_params=pltpu.CompilerParams(
            dimension_semantics=("parallel",),         # both TCs on v7x
            vmem_limit_bytes=32 * 1024 * 1024),        # v5e default is only 16 MiB
        cost_estimate=cost,
    )(xx, wih2, bcat, whh2, w1, b1, w2t, b2t)

    # (B, 2, T) classes x time  ->  (B, T, 2) batch-first, matching the module.
    return jnp.transpose(out_ct, (0, 2, 1))


def init_params(key, inp_size, hid_size):
    """Deterministic parameter init matching the module's shapes.
    LSTM: uniform(-1/sqrt(H), 1/sqrt(H)); dense weights: kaiming-uniform style."""
    ks = jax.random.split(key, 12)
    H, I = hid_size, inp_size
    k = 1.0 / jnp.sqrt(jnp.float32(H))

    def u(kk, shape, bound):
        return jax.random.uniform(kk, shape, jnp.float32, -bound, bound)

    # LSTM weights stored pre-transposed for "x @ W" form; gate order (i,f,g,o).
    wih_f = u(ks[0], (I, 4 * H), k)
    whh_f = u(ks[1], (H, 4 * H), k)
    b_f = (u(ks[2], (1, 4 * H), k) + u(ks[3], (1, 4 * H), k))   # b_ih + b_hh
    wih_b = u(ks[4], (I, 4 * H), k)
    whh_b = u(ks[5], (H, 4 * H), k)
    b_b = (u(ks[6], (1, 4 * H), k) + u(ks[7], (1, 4 * H), k))

    bound1 = jnp.sqrt(6.0 / (2 * H))
    w1 = u(ks[8], (2 * H, 50), bound1)
    b1 = u(ks[9], (1, 50), 1.0 / jnp.sqrt(jnp.float32(2 * H)))
    bound2 = jnp.sqrt(6.0 / 50.0)
    w2 = u(ks[10], (50, 2), bound2)
    b2 = u(ks[11], (1, 2), 1.0 / jnp.sqrt(jnp.float32(50)))

    return dict(wih_f=wih_f, whh_f=whh_f, b_f=b_f,
                wih_b=wih_b, whh_b=whh_b, b_b=b_b,
                w1=w1, b1=b1, w2=w2, b2=b2)


def reference_forward(x, p):
    """Pure-JAX f32 reference mirroring the PyTorch forward (for validation)."""
    B, T, I = x.shape
    H = p["whh_f"].shape[0]

    def run_dir(x_tm, wih, whh, b):
        def step(carry, x_t):
            h, c = carry
            g = x_t @ wih + h @ whh + b[0]
            i_g = jax.nn.sigmoid(g[:, :H])
            f_g = jax.nn.sigmoid(g[:, H:2 * H])
            g_g = jnp.tanh(g[:, 2 * H:3 * H])
            o_g = jax.nn.sigmoid(g[:, 3 * H:])
            c = f_g * c + i_g * g_g
            h = o_g * jnp.tanh(c)
            return (h, c), h
        init = (jnp.zeros((B, H)), jnp.zeros((B, H)))
        _, hs = lax.scan(step, init, x_tm)
        return hs  # (T, B, H)

    x_tm = jnp.transpose(x, (1, 0, 2))
    hf = run_dir(x_tm, p["wih_f"], p["whh_f"], p["b_f"])
    hb = run_dir(x_tm[::-1], p["wih_b"], p["whh_b"], p["b_b"])[::-1]
    ops = jnp.concatenate([hf, hb], axis=-1)                 # (T, B, 2H)
    ops = jnp.transpose(ops, (1, 0, 2))                      # (B, T, 2H)
    z1 = jnp.maximum(ops @ p["w1"] + p["b1"][0], 0.0)
    z2 = z1 @ p["w2"] + p["b2"][0]                           # (B, T, 2)
    return jax.nn.log_softmax(z2, axis=1)                    # dim=1 == time axis


# TODO(synk): mask_loss_soft / mask_loss_hard / pseudooutput_loss are training-time
# loss helpers (not part of forward) and are not translated to Pallas.

if __name__ == "__main__":
    B, T, INP, HID = 2, 8, 16, 32
    key = jax.random.PRNGKey(0)
    kx, kp = jax.random.split(key)
    x = jax.random.normal(kx, (B, T, INP), jnp.float32)
    params = init_params(kp, INP, HID)

    out = bilstm_forward(x, params)
    out = jax.block_until_ready(out)

    ref = reference_forward(x, params)
    assert out.shape == (B, T, 2), out.shape
    max_diff = jnp.max(jnp.abs(out - ref))
    # bf16 MXU operands vs the f32 reference -> loosened tolerance (per review).
    assert jnp.allclose(out, ref, atol=5e-2, rtol=5e-2), \
        f"max abs diff {max_diff}"
    print("KERNEL_OK")
</pallas_src>

<mosaic_0001>
module attributes {stable_mosaic.version = 11 : i64} {
  func.func @bilstm_kernel(%arg0: i32, %arg1: memref<1x8x32xbf16, #tpu.memory_space<vmem>>, %arg2: memref<32x256xbf16, #tpu.memory_space<vmem>>, %arg3: memref<1x256xf32, #tpu.memory_space<vmem>>, %arg4: memref<64x256xbf16, #tpu.memory_space<vmem>>, %arg5: memref<64x50xbf16, #tpu.memory_space<vmem>>, %arg6: memref<1x50xf32, #tpu.memory_space<vmem>>, %arg7: memref<2x50xbf16, #tpu.memory_space<vmem>>, %arg8: memref<2x1xf32, #tpu.memory_space<vmem>>, %arg9: memref<1x2x8xf32, #tpu.memory_space<vmem>>, %arg10: memref<8x256xf32, #tpu.memory_space<vmem>>, %arg11: memref<8x64xf32, #tpu.memory_space<vmem>>) attributes {dimension_semantics = [#tpu.dimension_semantics<parallel>], iteration_bounds = array<i64: 2>, scalar_prefetch = 0 : i64, scratch_operands = 2 : i64, tpu.core_type = #tpu.core_type<tc>, window_params = [{transform_indices = @transform_0, window_bounds = array<i64: 1, 8, 32>}, {pipeline_mode = #tpu.pipeline_mode<synchronous>, transform_indices = @transform_1, window_bounds = array<i64: 32, 256>}, {pipeline_mode = #tpu.pipeline_mode<synchronous>, transform_indices = @transform_2, window_bounds = array<i64: 1, 256>}, {pipeline_mode = #tpu.pipeline_mode<synchronous>, transform_indices = @transform_3, window_bounds = array<i64: 64, 256>}, {pipeline_mode = #tpu.pipeline_mode<synchronous>, transform_indices = @transform_4, window_bounds = array<i64: 64, 50>}, {pipeline_mode = #tpu.pipeline_mode<synchronous>, transform_indices = @transform_5, window_bounds = array<i64: 1, 50>}, {pipeline_mode = #tpu.pipeline_mode<synchronous>, transform_indices = @transform_6, window_bounds = array<i64: 2, 50>}, {pipeline_mode = #tpu.pipeline_mode<synchronous>, transform_indices = @transform_7, window_bounds = array<i64: 2, 1>}, {transform_indices = @transform_8, window_bounds = array<i64: 1, 2, 8>}]} {
    %c0 = arith.constant 0 : index
    %c0_0 = arith.constant 0 : index
    %c0_1 = arith.constant 0 : index
    %0 = vector.load %arg1[%c0, %c0_0, %c0_1] : memref<1x8x32xbf16, #tpu.memory_space<vmem>>, vector<1x8x32xbf16>
    %1 = vector.shape_cast %0 : vector<1x8x32xbf16> to vector<8x32xbf16>
    %c0_2 = arith.constant 0 : index
    %c0_3 = arith.constant 0 : index
    %2 = vector.load %arg2[%c0_2, %c0_3] : memref<32x256xbf16, #tpu.memory_space<vmem>>, vector<32x256xbf16>
    %cst = arith.constant dense<0.000000e+00> : vector<8x256xf32>
    %3 = tpu.matmul %1, %2, %cst {dimension_numbers = #tpu.dot_dimension_numbers<[1], [0], [0], [1], [0, 0, 1, 1], [], []>} : vector<8x32xbf16>, vector<32x256xbf16>, vector<8x256xf32> -> vector<8x256xf32>
    %c0_4 = arith.constant 0 : index
    %c0_5 = arith.constant 0 : index
    %4 = vector.load %arg3[%c0_4, %c0_5] : memref<1x256xf32, #tpu.memory_space<vmem>>, vector<1x256xf32>
    %5 = vector.broadcast %4 : vector<1x256xf32> to vector<8x256xf32>
    %6 = arith.addf %3, %5 : vector<8x256xf32>
    %c0_6 = arith.constant 0 : index
    %c0_7 = arith.constant 0 : index
    %7 = vector.load %arg10[%c0_6, %c0_7] : memref<8x256xf32, #tpu.memory_space<vmem>>, vector<8x256xf32>
    tpu.vector_store %arg10[%c0_6, %c0_7], %6 {strides = array<i32>} : memref<8x256xf32, #tpu.memory_space<vmem>>, vector<8x256xf32>,
    %c0_8 = arith.constant 0 : index
    %c0_9 = arith.constant 0 : index
    %8 = vector.load %arg4[%c0_8, %c0_9] : memref<64x256xbf16, #tpu.memory_space<vmem>>, vector<64x256xbf16>
    %cst_10 = arith.constant 0.000000e+00 : f32
    %9 = vector.broadcast %cst_10 : f32 to vector<1x64xf32>
    %c0_i32 = arith.constant 0 : i32
    %10 = arith.index_cast %c0_i32 : i32 to index
    %c0_11 = arith.constant 0 : index
    %11 = vector.load %arg10[%10, %c0_11] : memref<8x256xf32, #tpu.memory_space<vmem>>, vector<1x256xf32>
    %12 = arith.truncf %9 : vector<1x64xf32> to vector<1x64xbf16>
    %cst_12 = arith.constant dense<0.000000e+00> : vector<1x256xf32>
    %13 = tpu.matmul %12, %8, %cst_12 {dimension_numbers = #tpu.dot_dimension_numbers<[1], [0], [0], [1], [0, 0, 1, 1], [], []>} : vector<1x64xbf16>, vector<64x256xbf16>, vector<1x256xf32> -> vector<1x256xf32>
    %14 = arith.addf %11, %13 : vector<1x256xf32>
    %15 = vector.extract_strided_slice %14 {offsets = [0, 0], sizes = [1, 64], strides = [1, 1]} : vector<1x256xf32> to vector<1x64xf32>
    %16 = arith.negf %15 : vector<1x64xf32>
    %17 = math.exp %16 : vector<1x64xf32>
    %cst_13 = arith.constant 1.000000e+00 : f32
    %18 = vector.broadcast %cst_13 : f32 to vector<1x64xf32>
    %19 = arith.addf %18, %17 : vector<1x64xf32>
    %20 = arith.divf %18, %19 : vector<1x64xf32>
    %21 = vector.extract_strided_slice %14 {offsets = [0, 64], sizes = [1, 64], strides = [1, 1]} : vector<1x256xf32> to vector<1x64xf32>
    %22 = arith.negf %21 : vector<1x64xf32>
    %23 = math.exp %22 : vector<1x64xf32>
    %cst_14 = arith.constant 1.000000e+00 : f32
    %24 = vector.broadcast %cst_14 : f32 to vector<1x64xf32>
    %25 = arith.addf %24, %23 : vector<1x64xf32>
    %26 = arith.divf %24, %25 : vector<1x64xf32>
    %27 = vector.extract_strided_slice %14 {offsets = [0, 128], sizes = [1, 64], strides = [1, 1]} : vector<1x256xf32> to vector<1x64xf32>
    %28 = math.tanh %27 : vector<1x64xf32>
    %29 = vector.extract_strided_slice %14 {offsets = [0, 192], sizes = [1, 64], strides = [1, 1]} : vector<1x256xf32> to vector<1x64xf32>
    %30 = arith.negf %29 : vector<1x64xf32>
    %31 = math.exp %30 : vector<1x64xf32>
    %cst_15 = arith.constant 1.000000e+00 : f32
    %32 = vector.broadcast %cst_15 : f32 to vector<1x64xf32>
    %33 = arith.addf %32, %31 : vector<1x64xf32>
    %34 = arith.divf %32, %33 : vector<1x64xf32>
    %35 = arith.mulf %26, %9 : vector<1x64xf32>
    %36 = arith.mulf %20, %28 : vector<1x64xf32>
    %37 = arith.addf %35, %36 : vector<1x64xf32>
    %38 = math.tanh %37 : vector<1x64xf32>
    %39 = arith.mulf %34, %38 : vector<1x64xf32>
    %40 = vector.extract_strided_slice %39 {offsets = [0, 0], sizes = [1, 32], strides = [1, 1]} : vector<1x64xf32> to vector<1x32xf32>
    %41 = arith.index_cast %c0_i32 : i32 to index
    %c0_16 = arith.constant 0 : index
    %42 = vector.load %arg11[%41, %c0_16] : memref<8x64xf32, #tpu.memory_space<vmem>>, vector<1x32xf32>
    tpu.vector_store %arg11[%41, %c0_16], %40 {strides = array<i32>} : memref<8x64xf32, #tpu.memory_space<vmem>>, vector<1x32xf32>,
    %43 = vector.extract_strided_slice %39 {offsets = [0, 32], sizes = [1, 32], strides = [1, 1]} : vector<1x64xf32> to vector<1x32xf32>
    %c7_i32 = arith.constant 7 : i32
    %44 = arith.subi %c7_i32, %c0_i32 : i32
    %45 = arith.index_cast %44 : i32 to index
    %c32 = arith.constant 32 : index
    %46 = vector.load %arg11[%45, %c32] : memref<8x64xf32, #tpu.memory_space<vmem>>, vector<1x32xf32>
    tpu.vector_store %arg11[%45, %c32], %43 {strides = array<i32>} : memref<8x64xf32, #tpu.memory_space<vmem>>, vector<1x32xf32>,
    %c1_i32 = arith.constant 1 : i32
    %47 = arith.index_cast %c1_i32 : i32 to index
    %c0_17 = arith.constant 0 : index
    %48 = vector.load %arg10[%47, %c0_17] : memref<8x256xf32, #tpu.memory_space<vmem>>, vector<1x256xf32>
    %49 = arith.truncf %39 : vector<1x64xf32> to vector<1x64xbf16>
    %cst_18 = arith.constant dense<0.000000e+00> : vector<1x256xf32>
    %50 = tpu.matmul %49, %8, %cst_18 {dimension_numbers = #tpu.dot_dimension_numbers<[1], [0], [0], [1], [0, 0, 1, 1], [], []>} : vector<1x64xbf16>, vector<64x256xbf16>, vector<1x256xf32> -> vector<1x256xf32>
    %51 = arith.addf %48, %50 : vector<1x256xf32>
    %52 = vector.extract_strided_slice %51 {offsets = [0, 0], sizes = [1, 64], strides = [1, 1]} : vector<1x256xf32> to vector<1x64xf32>
    %53 = arith.negf %52 : vector<1x64xf32>
    %54 = math.exp %53 : vector<1x64xf32>
    %cst_19 = arith.constant 1.000000e+00 : f32
    %55 = vector.broadcast %cst_19 : f32 to vector<1x64xf32>
    %56 = arith.addf %55, %54 : vector<1x64xf32>
    %57 = arith.divf %55, %56 : vector<1x64xf32>
    %58 = vector.extract_strided_slice %51 {offsets = [0, 64], sizes = [1, 64], strides = [1, 1]} : vector<1x256xf32> to vector<1x64xf32>
    %59 = arith.negf %58 : vector<1x64xf32>
    %60 = math.exp %59 : vector<1x64xf32>
    %cst_20 = arith.constant 1.000000e+00 : f32
    %61 = vector.broadcast %cst_20 : f32 to vector<1x64xf32>
    %62 = arith.addf %61, %60 : vector<1x64xf32>
    %63 = arith.divf %61, %62 : vector<1x64xf32>
    %64 = vector.extract_strided_slice %51 {offsets = [0, 128], sizes = [1, 64], strides = [1, 1]} : vector<1x256xf32> to vector<1x64xf32>
    %65 = math.tanh %64 : vector<1x64xf32>
    %66 = vector.extract_strided_slice %51 {offsets = [0, 192], sizes = [1, 64], strides = [1, 1]} : vector<1x256xf32> to vector<1x64xf32>
    %67 = arith.negf %66 : vector<1x64xf32>
    %68 = math.exp %67 : vector<1x64xf32>
    %cst_21 = arith.constant 1.000000e+00 : f32
    %69 = vector.broadcast %cst_21 : f32 to vector<1x64xf32>
    %70 = arith.addf %69, %68 : vector<1x64xf32>
    %71 = arith.divf %69, %70 : vector<1x64xf32>
    %72 = arith.mulf %63, %37 : vector<1x64xf32>
    %73 = arith.mulf %57, %65 : vector<1x64xf32>
    %74 = arith.addf %72, %73 : vector<1x64xf32>
    %75 = math.tanh %74 : vector<1x64xf32>
    %76 = arith.mulf %71, %75 : vector<1x64xf32>
    %77 = vector.extract_strided_slice %76 {offsets = [0, 0], sizes = [1, 32], strides = [1, 1]} : vector<1x64xf32> to vector<1x32xf32>
    %78 = arith.index_cast %c1_i32 : i32 to index
    %c0_22 = arith.constant 0 : index
    %79 = vector.load %arg11[%78, %c0_22] : memref<8x64xf32, #tpu.memory_space<vmem>>, vector<1x32xf32>
    tpu.vector_store %arg11[%78, %c0_22], %77 {strides = array<i32>} : memref<8x64xf32, #tpu.memory_space<vmem>>, vector<1x32xf32>,
    %80 = vector.extract_strided_slice %76 {offsets = [0, 32], sizes = [1, 32], strides = [1, 1]} : vector<1x64xf32> to vector<1x32xf32>
    %c7_i32_23 = arith.constant 7 : i32
    %81 = arith.subi %c7_i32_23, %c1_i32 : i32
    %82 = arith.index_cast %81 : i32 to index
    %c32_24 = arith.constant 32 : index
    %83 = vector.load %arg11[%82, %c32_24] : memref<8x64xf32, #tpu.memory_space<vmem>>, vector<1x32xf32>
    tpu.vector_store %arg11[%82, %c32_24], %80 {strides = array<i32>} : memref<8x64xf32, #tpu.memory_space<vmem>>, vector<1x32xf32>,
    %c2_i32 = arith.constant 2 : i32
    %84 = arith.index_cast %c2_i32 : i32 to index
    %c0_25 = arith.constant 0 : index
    %85 = vector.load %arg10[%84, %c0_25] : memref<8x256xf32, #tpu.memory_space<vmem>>, vector<1x256xf32>
    %86 = arith.truncf %76 : vector<1x64xf32> to vector<1x64xbf16>
    %cst_26 = arith.constant dense<0.000000e+00> : vector<1x256xf32>
    %87 = tpu.matmul %86, %8, %cst_26 {dimension_numbers = #tpu.dot_dimension_numbers<[1], [0], [0], [1], [0, 0, 1, 1], [], []>} : vector<1x64xbf16>, vector<64x256xbf16>, vector<1x256xf32> -> vector<1x256xf32>
    %88 = arith.addf %85, %87 : vector<1x256xf32>
    %89 = vector.extract_strided_slice %88 {offsets = [0, 0], sizes = [1, 64], strides = [1, 1]} : vector<1x256xf32> to vector<1x64xf32>
    %90 = arith.negf %89 : vector<1x64xf32>
    %91 = math.exp %90 : vector<1x64xf32>
    %cst_27 = arith.constant 1.000000e+00 : f32
    %92 = vector.broadcast %cst_27 : f32 to vector<1x64xf32>
    %93 = arith.addf %92, %91 : vector<1x64xf32>
    %94 = arith.divf %92, %93 : vector<1x64xf32>
    %95 = vector.extract_strided_slice %88 {offsets = [0, 64], sizes = [1, 64], strides = [1, 1]} : vector<1x256xf32> to vector<1x64xf32>
    %96 = arith.negf %95 : vector<1x64xf32>
    %97 = math.exp %96 : vector<1x64xf32>
    %cst_28 = arith.constant 1.000000e+00 : f32
    %98 = vector.broadcast %cst_28 : f32 to vector<1x64xf32>
    %99 = arith.addf %98, %97 : vector<1x64xf32>
    %100 = arith.divf %98, %99 : vector<1x64xf32>
    %101 = vector.extract_strided_slice %88 {offsets = [0, 128], sizes = [1, 64], strides = [1, 1]} : vector<1x256xf32> to vector<1x64xf32>
    %102 = math.tanh %101 : vector<1x64xf32>
    %103 = vector.extract_strided_slice %88 {offsets = [0, 192], sizes = [1, 64], strides = [1, 1]} : vector<1x256xf32> to vector<1x64xf32>
    %104 = arith.negf %103 : vector<1x64xf32>
    %105 = math.exp %104 : vector<1x64xf32>
    %cst_29 = arith.constant 1.000000e+00 : f32
    %106 = vector.broadcast %cst_29 : f32 to vector<1x64xf32>
    %107 = arith.addf %106, %105 : vector<1x64xf32>
    %108 = arith.divf %106, %107 : vector<1x64xf32>
    %109 = arith.mulf %100, %74 : vector<1x64xf32>
    %110 = arith.mulf %94, %102 : vector<1x64xf32>
    %111 = arith.addf %109, %110 : vector<1x64xf32>
    %112 = math.tanh %111 : vector<1x64xf32>
    %113 = arith.mulf %108, %112 : vector<1x64xf32>
    %114 = vector.extract_strided_slice %113 {offsets = [0, 0], sizes = [1, 32], strides = [1, 1]} : vector<1x64xf32> to vector<1x32xf32>
    %115 = arith.index_cast %c2_i32 : i32 to index
    %c0_30 = arith.constant 0 : index
    %116 = vector.load %arg11[%115, %c0_30] : memref<8x64xf32, #tpu.memory_space<vmem>>, vector<1x32xf32>
    tpu.vector_store %arg11[%115, %c0_30], %114 {strides = array<i32>} : memref<8x64xf32, #tpu.memory_space<vmem>>, vector<1x32xf32>,
    %117 = vector.extract_strided_slice %113 {offsets = [0, 32], sizes = [1, 32], strides = [1, 1]} : vector<1x64xf32> to vector<1x32xf32>
    %c7_i32_31 = arith.constant 7 : i32
    %118 = arith.subi %c7_i32_31, %c2_i32 : i32
    %119 = arith.index_cast %118 : i32 to index
    %c32_32 = arith.constant 32 : index
    %120 = vector.load %arg11[%119, %c32_32] : memref<8x64xf32, #tpu.memory_space<vmem>>, vector<1x32xf32>
    tpu.vector_store %arg11[%119, %c32_32], %117 {strides = array<i32>} : memref<8x64xf32, #tpu.memory_space<vmem>>, vector<1x32xf32>,
    %c3_i32 = arith.constant 3 : i32
    %121 = arith.index_cast %c3_i32 : i32 to index
    %c0_33 = arith.constant 0 : index
    %122 = vector.load %arg10[%121, %c0_33] : memref<8x256xf32, #tpu.memory_space<vmem>>, vector<1x256xf32>
    %123 = arith.truncf %113 : vector<1x64xf32> to vector<1x64xbf16>
    %cst_34 = arith.constant dense<0.000000e+00> : vector<1x256xf32>
    %124 = tpu.matmul %123, %8, %cst_34 {dimension_numbers = #tpu.dot_dimension_numbers<[1], [0], [0], [1], [0, 0, 1, 1], [], []>} : vector<1x64xbf16>, vector<64x256xbf16>, vector<1x256xf32> -> vector<1x256xf32>
    %125 = arith.addf %122, %124 : vector<1x256xf32>
    %126 = vector.extract_strided_slice %125 {offsets = [0, 0], sizes = [1, 64], strides = [1, 1]} : vector<1x256xf32> to vector<1x64xf32>
    %127 = arith.negf %126 : vector<1x64xf32>
    %128 = math.exp %127 : vector<1x64xf32>
    %cst_35 = arith.constant 1.000000e+00 : f32
    %129 = vector.broadcast %cst_35 : f32 to vector<1x64xf32>
    %130 = arith.addf %129, %128 : vector<1x64xf32>
    %131 = arith.divf %129, %130 : vector<1x64xf32>
    %132 = vector.extract_strided_slice %125 {offsets = [0, 64], sizes = [1, 64], strides = [1, 1]} : vector<1x256xf32> to vector<1x64xf32>
    %133 = arith.negf %132 : vector<1x64xf32>
    %134 = math.exp %133 : vector<1x64xf32>
    %cst_36 = arith.constant 1.000000e+00 : f32
    %135 = vector.broadcast %cst_36 : f32 to vector<1x64xf32>
    %136 = arith.addf %135, %134 : vector<1x64xf32>
    %137 = arith.divf %135, %136 : vector<1x64xf32>
    %138 = vector.extract_strided_slice %125 {offsets = [0, 128], sizes = [1, 64], strides = [1, 1]} : vector<1x256xf32> to vector<1x64xf32>
    %139 = math.tanh %138 : vector<1x64xf32>
    %140 = vector.extract_strided_slice %125 {offsets = [0, 192], sizes = [1, 64], strides = [1, 1]} : vector<1x256xf32> to vector<1x64xf32>
    %141 = arith.negf %140 : vector<1x64xf32>
    %142 = math.exp %141 : vector<1x64xf32>
    %cst_37 = arith.constant 1.000000e+00 : f32
    %143 = vector.broadcast %cst_37 : f32 to vector<1x64xf32>
    %144 = arith.addf %143, %142 : vector<1x64xf32>
    %145 = arith.divf %143, %144 : vector<1x64xf32>
    %146 = arith.mulf %137, %111 : vector<1x64xf32>
    %147 = arith.mulf %131, %139 : vector<1x64xf32>
    %148 = arith.addf %146, %147 : vector<1x64xf32>
    %149 = math.tanh %148 : vector<1x64xf32>
    %150 = arith.mulf %145, %149 : vector<1x64xf32>
    %151 = vector.extract_strided_slice %150 {offsets = [0, 0], sizes = [1, 32], strides = [1, 1]} : vector<1x64xf32> to vector<1x32xf32>
    %152 = arith.index_cast %c3_i32 : i32 to index
    %c0_38 = arith.constant 0 : index
    %153 = vector.load %arg11[%152, %c0_38] : memref<8x64xf32, #tpu.memory_space<vmem>>, vector<1x32xf32>
    tpu.vector_store %arg11[%152, %c0_38], %151 {strides = array<i32>} : memref<8x64xf32, #tpu.memory_space<vmem>>, vector<1x32xf32>,
    %154 = vector.extract_strided_slice %150 {offsets = [0, 32], sizes = [1, 32], strides = [1, 1]} : vector<1x64xf32> to vector<1x32xf32>
    %c7_i32_39 = arith.constant 7 : i32
    %155 = arith.subi %c7_i32_39, %c3_i32 : i32
    %156 = arith.index_cast %155 : i32 to index
    %c32_40 = arith.constant 32 : index
    %157 = vector.load %arg11[%156, %c32_40] : memref<8x64xf32, #tpu.memory_space<vmem>>, vector<1x32xf32>
    tpu.vector_store %arg11[%156, %c32_40], %154 {strides = array<i32>} : memref<8x64xf32, #tpu.memory_space<vmem>>, vector<1x32xf32>,
    %c4_i32 = arith.constant 4 : i32
    %158 = arith.index_cast %c4_i32 : i32 to index
    %c0_41 = arith.constant 0 : index
    %159 = vector.load %arg10[%158, %c0_41] : memref<8x256xf32, #tpu.memory_space<vmem>>, vector<1x256xf32>
    %160 = arith.truncf %150 : vector<1x64xf32> to vector<1x64xbf16>
    %cst_42 = arith.constant dense<0.000000e+00> : vector<1x256xf32>
    %161 = tpu.matmul %160, %8, %cst_42 {dimension_numbers = #tpu.dot_dimension_numbers<[1], [0], [0], [1], [0, 0, 1, 1], [], []>} : vector<1x64xbf16>, vector<64x256xbf16>, vector<1x256xf32> -> vector<1x256xf32>
    %162 = arith.addf %159, %161 : vector<1x256xf32>
    %163 = vector.extract_strided_slice %162 {offsets = [0, 0], sizes = [1, 64], strides = [1, 1]} : vector<1x256xf32> to vector<1x64xf32>
    %164 = arith.negf %163 : vector<1x64xf32>
    %165 = math.exp %164 : vector<1x64xf32>
    %cst_43 = arith.constant 1.000000e+00 : f32
    %166 = vector.broadcast %cst_43 : f32 to vector<1x64xf32>
    %167 = arith.addf %166, %165 : vector<1x64xf32>
    %168 = arith.divf %166, %167 : vector<1x64xf32>
    %169 = vector.extract_strided_slice %162 {offsets = [0, 64], sizes = [1, 64], strides = [1, 1]} : vector<1x256xf32> to vector<1x64xf32>
    %170 = arith.negf %169 : vector<1x64xf32>
    %171 = math.exp %170 : vector<1x64xf32>
    %cst_44 = arith.constant 1.000000e+00 : f32
    %172 = vector.broadcast %cst_44 : f32 to vector<1x64xf32>
    %173 = arith.addf %172, %171 : vector<1x64xf32>
    %174 = arith.divf %172, %173 : vector<1x64xf32>
    %175 = vector.extract_strided_slice %162 {offsets = [0, 128], sizes = [1, 64], strides = [1, 1]} : vector<1x256xf32> to vector<1x64xf32>
    %176 = math.tanh %175 : vector<1x64xf32>
    %177 = vector.extract_strided_slice %162 {offsets = [0, 192], sizes = [1, 64], strides = [1, 1]} : vector<1x256xf32> to vector<1x64xf32>
    %178 = arith.negf %177 : vector<1x64xf32>
    %179 = math.exp %178 : vector<1x64xf32>
    %cst_45 = arith.constant 1.000000e+00 : f32
    %180 = vector.broadcast %cst_45 : f32 to vector<1x64xf32>
    %181 = arith.addf %180, %179 : vector<1x64xf32>
    %182 = arith.divf %180, %181 : vector<1x64xf32>
    %183 = arith.mulf %174, %148 : vector<1x64xf32>
    %184 = arith.mulf %168, %176 : vector<1x64xf32>
    %185 = arith.addf %183, %184 : vector<1x64xf32>
    %186 = math.tanh %185 : vector<1x64xf32>
    %187 = arith.mulf %182, %186 : vector<1x64xf32>
    %188 = vector.extract_strided_slice %187 {offsets = [0, 0], sizes = [1, 32], strides = [1, 1]} : vector<1x64xf32> to vector<1x32xf32>
    %189 = arith.index_cast %c4_i32 : i32 to index
    %c0_46 = arith.constant 0 : index
    %190 = vector.load %arg11[%189, %c0_46] : memref<8x64xf32, #tpu.memory_space<vmem>>, vector<1x32xf32>
    tpu.vector_store %arg11[%189, %c0_46], %188 {strides = array<i32>} : memref<8x64xf32, #tpu.memory_space<vmem>>, vector<1x32xf32>,
    %191 = vector.extract_strided_slice %187 {offsets = [0, 32], sizes = [1, 32], strides = [1, 1]} : vector<1x64xf32> to vector<1x32xf32>
    %c7_i32_47 = arith.constant 7 : i32
    %192 = arith.subi %c7_i32_47, %c4_i32 : i32
    %193 = arith.index_cast %192 : i32 to index
    %c32_48 = arith.constant 32 : index
    %194 = vector.load %arg11[%193, %c32_48] : memref<8x64xf32, #tpu.memory_space<vmem>>, vector<1x32xf32>
    tpu.vector_store %arg11[%193, %c32_48], %191 {strides = array<i32>} : memref<8x64xf32, #tpu.memory_space<vmem>>, vector<1x32xf32>,
    %c5_i32 = arith.constant 5 : i32
    %195 = arith.index_cast %c5_i32 : i32 to index
    %c0_49 = arith.constant 0 : index
    %196 = vector.load %arg10[%195, %c0_49] : memref<8x256xf32, #tpu.memory_space<vmem>>, vector<1x256xf32>
    %197 = arith.truncf %187 : vector<1x64xf32> to vector<1x64xbf16>
    %cst_50 = arith.constant dense<0.000000e+00> : vector<1x256xf32>
    %198 = tpu.matmul %197, %8, %cst_50 {dimension_numbers = #tpu.dot_dimension_numbers<[1], [0], [0], [1], [0, 0, 1, 1], [], []>} : vector<1x64xbf16>, vector<64x256xbf16>, vector<1x256xf32> -> vector<1x256xf32>
    %199 = arith.addf %196, %198 : vector<1x256xf32>
    %200 = vector.extract_strided_slice %199 {offsets = [0, 0], sizes = [1, 64], strides = [1, 1]} : vector<1x256xf32> to vector<1x64xf32>
    %201 = arith.negf %200 : vector<1x64xf32>
    %202 = math.exp %201 : vector<1x64xf32>
    %cst_51 = arith.constant 1.000000e+00 : f32
    %203 = vector.broadcast %cst_51 : f32 to vector<1x64xf32>
    %204 = arith.addf %203, %202 : vector<1x64xf32>
    %205 = arith.divf %203, %204 : vector<1x64xf32>
    %206 = vector.extract_strided_slice %199 {offsets = [0, 64], sizes = [1, 64], strides = [1, 1]} : vector<1x256xf32> to vector<1x64xf32>
    %207 = arith.negf %206 : vector<1x64xf32>
    %208 = math.exp %207 : vector<1x64xf32>
    %cst_52 = arith.constant 1.000000e+00 : f32
    %209 = vector.broadcast %cst_52 : f32 to vector<1x64xf32>
    %210 = arith.addf %209, %208 : vector<1x64xf32>
    %211 = arith.divf %209, %210 : vector<1x64xf32>
    %212 = vector.extract_strided_slice %199 {offsets = [0, 128], sizes = [1, 64], strides = [1, 1]} : vector<1x256xf32> to vector<1x64xf32>
    %213 = math.tanh %212 : vector<1x64xf32>
    %214 = vector.extract_strided_slice %199 {offsets = [0, 192], sizes = [1, 64], strides = [1, 1]} : vector<1x256xf32> to vector<1x64xf32>
    %215 = arith.negf %214 : vector<1x64xf32>
    %216 = math.exp %215 : vector<1x64xf32>
    %cst_53 = arith.constant 1.000000e+00 : f32
    %217 = vector.broadcast %cst_53 : f32 to vector<1x64xf32>
    %218 = arith.addf %217, %216 : vector<1x64xf32>
    %219 = arith.divf %217, %218 : vector<1x64xf32>
    %220 = arith.mulf %211, %185 : vector<1x64xf32>
    %221 = arith.mulf %205, %213 : vector<1x64xf32>
    %222 = arith.addf %220, %221 : vector<1x64xf32>
    %223 = math.tanh %222 : vector<1x64xf32>
    %224 = arith.mulf %219, %223 : vector<1x64xf32>
    %225 = vector.extract_strided_slice %224 {offsets = [0, 0], sizes = [1, 32], strides = [1, 1]} : vector<1x64xf32> to vector<1x32xf32>
    %226 = arith.index_cast %c5_i32 : i32 to index
    %c0_54 = arith.constant 0 : index
    %227 = vector.load %arg11[%226, %c0_54] : memref<8x64xf32, #tpu.memory_space<vmem>>, vector<1x32xf32>
    tpu.vector_store %arg11[%226, %c0_54], %225 {strides = array<i32>} : memref<8x64xf32, #tpu.memory_space<vmem>>, vector<1x32xf32>,
    %228 = vector.extract_strided_slice %224 {offsets = [0, 32], sizes = [1, 32], strides = [1, 1]} : vector<1x64xf32> to vector<1x32xf32>
    %c7_i32_55 = arith.constant 7 : i32
    %229 = arith.subi %c7_i32_55, %c5_i32 : i32
    %230 = arith.index_cast %229 : i32 to index
    %c32_56 = arith.constant 32 : index
    %231 = vector.load %arg11[%230, %c32_56] : memref<8x64xf32, #tpu.memory_space<vmem>>, vector<1x32xf32>
    tpu.vector_store %arg11[%230, %c32_56], %228 {strides = array<i32>} : memref<8x64xf32, #tpu.memory_space<vmem>>, vector<1x32xf32>,
    %c6_i32 = arith.constant 6 : i32
    %232 = arith.index_cast %c6_i32 : i32 to index
    %c0_57 = arith.constant 0 : index
    %233 = vector.load %arg10[%232, %c0_57] : memref<8x256xf32, #tpu.memory_space<vmem>>, vector<1x256xf32>
    %234 = arith.truncf %224 : vector<1x64xf32> to vector<1x64xbf16>
    %cst_58 = arith.constant dense<0.000000e+00> : vector<1x256xf32>
    %235 = tpu.matmul %234, %8, %cst_58 {dimension_numbers = #tpu.dot_dimension_numbers<[1], [0], [0], [1], [0, 0, 1, 1], [], []>} : vector<1x64xbf16>, vector<64x256xbf16>, vector<1x256xf32> -> vector<1x256xf32>
    %236 = arith.addf %233, %235 : vector<1x256xf32>
    %237 = vector.extract_strided_slice %236 {offsets = [0, 0], sizes = [1, 64], strides = [1, 1]} : vector<1x256xf32> to vector<1x64xf32>
    %238 = arith.negf %237 : vector<1x64xf32>
    %239 = math.exp %238 : vector<1x64xf32>
    %cst_59 = arith.constant 1.000000e+00 : f32
    %240 = vector.broadcast %cst_59 : f32 to vector<1x64xf32>
    %241 = arith.addf %240, %239 : vector<1x64xf32>
    %242 = arith.divf %240, %241 : vector<1x64xf32>
    %243 = vector.extract_strided_slice %236 {offsets = [0, 64], sizes = [1, 64], strides = [1, 1]} : vector<1x256xf32> to vector<1x64xf32>
    %244 = arith.negf %243 : vector<1x64xf32>
    %245 = math.exp %244 : vector<1x64xf32>
    %cst_60 = arith.constant 1.000000e+00 : f32
    %246 = vector.broadcast %cst_60 : f32 to vector<1x64xf32>
    %247 = arith.addf %246, %245 : vector<1x64xf32>
    %248 = arith.divf %246, %247 : vector<1x64xf32>
    %249 = vector.extract_strided_slice %236 {offsets = [0, 128], sizes = [1, 64], strides = [1, 1]} : vector<1x256xf32> to vector<1x64xf32>
    %250 = math.tanh %249 : vector<1x64xf32>
    %251 = vector.extract_strided_slice %236 {offsets = [0, 192], sizes = [1, 64], strides = [1, 1]} : vector<1x256xf32> to vector<1x64xf32>
    %252 = arith.negf %251 : vector<1x64xf32>
    %253 = math.exp %252 : vector<1x64xf32>
    %cst_61 = arith.constant 1.000000e+00 : f32
    %254 = vector.broadcast %cst_61 : f32 to vector<1x64xf32>
    %255 = arith.addf %254, %253 : vector<1x64xf32>
    %256 = arith.divf %254, %255 : vector<1x64xf32>
    %257 = arith.mulf %248, %222 : vector<1x64xf32>
    %258 = arith.mulf %242, %250 : vector<1x64xf32>
    %259 = arith.addf %257, %258 : vector<1x64xf32>
    %260 = math.tanh %259 : vector<1x64xf32>
    %261 = arith.mulf %256, %260 : vector<1x64xf32>
    %262 = vector.extract_strided_slice %261 {offsets = [0, 0], sizes = [1, 32], strides = [1, 1]} : vector<1x64xf32> to vector<1x32xf32>
    %263 = arith.index_cast %c6_i32 : i32 to index
    %c0_62 = arith.constant 0 : index
    %264 = vector.load %arg11[%263, %c0_62] : memref<8x64xf32, #tpu.memory_space<vmem>>, vector<1x32xf32>
    tpu.vector_store %arg11[%263, %c0_62], %262 {strides = array<i32>} : memref<8x64xf32, #tpu.memory_space<vmem>>, vector<1x32xf32>,
    %265 = vector.extract_strided_slice %261 {offsets = [0, 32], sizes = [1, 32], strides = [1, 1]} : vector<1x64xf32> to vector<1x32xf32>
    %c7_i32_63 = arith.constant 7 : i32
    %266 = arith.subi %c7_i32_63, %c6_i32 : i32
    %267 = arith.index_cast %266 : i32 to index
    %c32_64 = arith.constant 32 : index
    %268 = vector.load %arg11[%267, %c32_64] : memref<8x64xf32, #tpu.memory_space<vmem>>, vector<1x32xf32>
    tpu.vector_store %arg11[%267, %c32_64], %265 {strides = array<i32>} : memref<8x64xf32, #tpu.memory_space<vmem>>, vector<1x32xf32>,
    %c7_i32_65 = arith.constant 7 : i32
    %269 = arith.index_cast %c7_i32_65 : i32 to index
    %c0_66 = arith.constant 0 : index
    %270 = vector.load %arg10[%269, %c0_66] : memref<8x256xf32, #tpu.memory_space<vmem>>, vector<1x256xf32>
    %271 = arith.truncf %261 : vector<1x64xf32> to vector<1x64xbf16>
    %cst_67 = arith.constant dense<0.000000e+00> : vector<1x256xf32>
    %272 = tpu.matmul %271, %8, %cst_67 {dimension_numbers = #tpu.dot_dimension_numbers<[1], [0], [0], [1], [0, 0, 1, 1], [], []>} : vector<1x64xbf16>, vector<64x256xbf16>, vector<1x256xf32> -> vector<1x256xf32>
    %273 = arith.addf %270, %272 : vector<1x256xf32>
    %274 = vector.extract_strided_slice %273 {offsets = [0, 0], sizes = [1, 64], strides = [1, 1]} : vector<1x256xf32> to vector<1x64xf32>
    %275 = arith.negf %274 : vector<1x64xf32>
    %276 = math.exp %275 : vector<1x64xf32>
    %cst_68 = arith.constant 1.000000e+00 : f32
    %277 = vector.broadcast %cst_68 : f32 to vector<1x64xf32>
    %278 = arith.addf %277, %276 : vector<1x64xf32>
    %279 = arith.divf %277, %278 : vector<1x64xf32>
    %280 = vector.extract_strided_slice %273 {offsets = [0, 64], sizes = [1, 64], strides = [1, 1]} : vector<1x256xf32> to vector<1x64xf32>
    %281 = arith.negf %280 : vector<1x64xf32>
    %282 = math.exp %281 : vector<1x64xf32>
    %cst_69 = arith.constant 1.000000e+00 : f32
    %283 = vector.broadcast %cst_69 : f32 to vector<1x64xf32>
    %284 = arith.addf %283, %282 : vector<1x64xf32>
    %285 = arith.divf %283, %284 : vector<1x64xf32>
    %286 = vector.extract_strided_slice %273 {offsets = [0, 128], sizes = [1, 64], strides = [1, 1]} : vector<1x256xf32> to vector<1x64xf32>
    %287 = math.tanh %286 : vector<1x64xf32>
    %288 = vector.extract_strided_slice %273 {offsets = [0, 192], sizes = [1, 64], strides = [1, 1]} : vector<1x256xf32> to vector<1x64xf32>
    %289 = arith.negf %288 : vector<1x64xf32>
    %290 = math.exp %289 : vector<1x64xf32>
    %cst_70 = arith.constant 1.000000e+00 : f32
    %291 = vector.broadcast %cst_70 : f32 to vector<1x64xf32>
    %292 = arith.addf %291, %290 : vector<1x64xf32>
    %293 = arith.divf %291, %292 : vector<1x64xf32>
    %294 = arith.mulf %285, %259 : vector<1x64xf32>
    %295 = arith.mulf %279, %287 : vector<1x64xf32>
    %296 = arith.addf %294, %295 : vector<1x64xf32>
    %297 = math.tanh %296 : vector<1x64xf32>
    %298 = arith.mulf %293, %297 : vector<1x64xf32>
    %299 = vector.extract_strided_slice %298 {offsets = [0, 0], sizes = [1, 32], strides = [1, 1]} : vector<1x64xf32> to vector<1x32xf32>
    %300 = arith.index_cast %c7_i32_65 : i32 to index
    %c0_71 = arith.constant 0 : index
    %301 = vector.load %arg11[%300, %c0_71] : memref<8x64xf32, #tpu.memory_space<vmem>>, vector<1x32xf32>
    tpu.vector_store %arg11[%300, %c0_71], %299 {strides = array<i32>} : memref<8x64xf32, #tpu.memory_space<vmem>>, vector<1x32xf32>,
    %302 = vector.extract_strided_slice %298 {offsets = [0, 32], sizes = [1, 32], strides = [1, 1]} : vector<1x64xf32> to vector<1x32xf32>
    %c7_i32_72 = arith.constant 7 : i32
    %303 = arith.subi %c7_i32_72, %c7_i32_65 : i32
    %304 = arith.index_cast %303 : i32 to index
    %c32_73 = arith.constant 32 : index
    %305 = vector.load %arg11[%304, %c32_73] : memref<8x64xf32, #tpu.memory_space<vmem>>, vector<1x32xf32>
    tpu.vector_store %arg11[%304, %c32_73], %302 {strides = array<i32>} : memref<8x64xf32, #tpu.memory_space<vmem>>, vector<1x32xf32>,
    %c8_i32 = arith.constant 8 : i32
    %c0_74 = arith.constant 0 : index
    %c0_75 = arith.constant 0 : index
    %306 = vector.load %arg11[%c0_74, %c0_75] : memref<8x64xf32, #tpu.memory_space<vmem>>, vector<8x64xf32>
    %307 = arith.truncf %306 : vector<8x64xf32> to vector<8x64xbf16>
    %c0_76 = arith.constant 0 : index
    %c0_77 = arith.constant 0 : index
    %308 = vector.load %arg5[%c0_76, %c0_77] : memref<64x50xbf16, #tpu.memory_space<vmem>>, vector<64x50xbf16>
    %cst_78 = arith.constant dense<0.000000e+00> : vector<8x50xf32>
    %309 = tpu.matmul %307, %308, %cst_78 {dimension_numbers = #tpu.dot_dimension_numbers<[1], [0], [0], [1], [0, 0, 1, 1], [], []>} : vector<8x64xbf16>, vector<64x50xbf16>, vector<8x50xf32> -> vector<8x50xf32>
    %c0_79 = arith.constant 0 : index
    %c0_80 = arith.constant 0 : index
    %310 = vector.load %arg6[%c0_79, %c0_80] : memref<1x50xf32, #tpu.memory_space<vmem>>, vector<1x50xf32>
    %311 = vector.broadcast %310 : vector<1x50xf32> to vector<8x50xf32>
    %312 = arith.addf %309, %311 : vector<8x50xf32>
    %cst_81 = arith.constant 0.000000e+00 : f32
    %313 = vector.broadcast %cst_81 : f32 to vector<8x50xf32>
    %314 = arith.maximumf %312, %313 : vector<8x50xf32>
    %c0_82 = arith.constant 0 : index
    %c0_83 = arith.constant 0 : index
    %315 = vector.load %arg7[%c0_82, %c0_83] : memref<2x50xbf16, #tpu.memory_space<vmem>>, vector<2x50xbf16>
    %316 = arith.truncf %314 : vector<8x50xf32> to vector<8x50xbf16>
    %cst_84 = arith.constant dense<0.000000e+00> : vector<2x8xf32>
    %317 = tpu.matmul %315, %316, %cst_84 {dimension_numbers = #tpu.dot_dimension_numbers<[1], [1], [0], [0], [0, 0, 1, 0], [], []>} : vector<2x50xbf16>, vector<8x50xbf16>, vector<2x8xf32> -> vector<2x8xf32>
    %c0_85 = arith.constant 0 : index
    %c0_86 = arith.constant 0 : index
    %318 = vector.load %arg8[%c0_85, %c0_86] : memref<2x1xf32, #tpu.memory_space<vmem>>, vector<2x1xf32>
    %319 = vector.broadcast %318 : vector<2x1xf32> to vector<2x8xf32>
    %320 = arith.addf %317, %319 : vector<2x8xf32>
    %cst_87 = arith.constant dense<0xFF800000> : vector<2xf32>
    %321 = vector.multi_reduction <maximumf>, %320, %cst_87 [1] : vector<2x8xf32> to vector<2xf32>
    %322 = vector.shape_cast %321 : vector<2xf32> to vector<2x1xf32>
    %323 = vector.broadcast %322 : vector<2x1xf32> to vector<2x8xf32>
    %324 = arith.subf %320, %323 : vector<2x8xf32>
    %325 = math.exp %324 : vector<2x8xf32>
    %cst_88 = arith.constant dense<0.000000e+00> : vector<2xf32>
    %326 = vector.multi_reduction <add>, %325, %cst_88 [1] : vector<2x8xf32> to vector<2xf32>
    %327 = vector.shape_cast %326 : vector<2xf32> to vector<2x1xf32>
    %328 = math.log %327 : vector<2x1xf32>
    %329 = vector.broadcast %328 : vector<2x1xf32> to vector<2x8xf32>
    %330 = arith.subf %324, %329 : vector<2x8xf32>
    %c0_89 = arith.constant 0 : index
    %c0_90 = arith.constant 0 : index
    %c0_91 = arith.constant 0 : index
    %331 = vector.load %arg9[%c0_89, %c0_90, %c0_91] : memref<1x2x8xf32, #tpu.memory_space<vmem>>, vector<1x2x8xf32>
    %332 = vector.shape_cast %331 : vector<1x2x8xf32> to vector<2x8xf32>
    %333 = vector.shape_cast %330 : vector<2x8xf32> to vector<1x2x8xf32>
    tpu.vector_store %arg9[%c0_89, %c0_90, %c0_91], %333 {strides = array<i32>} : memref<1x2x8xf32, #tpu.memory_space<vmem>>, vector<1x2x8xf32>,
    return
  }
  func.func @transform_0(%arg0: i32) -> (i32, i32, i32) {
    %c0_i32 = arith.constant 0 : i32
    %c0_i32_0 = arith.constant 0 : i32
    %c0_i32_1 = arith.constant 0 : i32
    return %arg0, %c0_i32, %c0_i32_0 : i32, i32, i32
  }
  func.func @transform_1(%arg0: i32) -> (i32, i32) {
    %c0_i32 = arith.constant 0 : i32
    %c0_i32_0 = arith.constant 0 : i32
    %c0_i32_1 = arith.constant 0 : i32
    return %c0_i32, %c0_i32_0 : i32, i32
  }
  func.func @transform_2(%arg0: i32) -> (i32, i32) {
    %c0_i32 = arith.constant 0 : i32
    %c0_i32_0 = arith.constant 0 : i32
    %c0_i32_1 = arith.constant 0 : i32
    return %c0_i32, %c0_i32_0 : i32, i32
  }
  func.func @transform_3(%arg0: i32) -> (i32, i32) {
    %c0_i32 = arith.constant 0 : i32
    %c0_i32_0 = arith.constant 0 : i32
    %c0_i32_1 = arith.constant 0 : i32
    return %c0_i32, %c0_i32_0 : i32, i32
  }
  func.func @transform_4(%arg0: i32) -> (i32, i32) {
    %c0_i32 = arith.constant 0 : i32
    %c0_i32_0 = arith.constant 0 : i32
    %c0_i32_1 = arith.constant 0 : i32
    return %c0_i32, %c0_i32_0 : i32, i32
  }
  func.func @transform_5(%arg0: i32) -> (i32, i32) {
    %c0_i32 = arith.constant 0 : i32
    %c0_i32_0 = arith.constant 0 : i32
    %c0_i32_1 = arith.constant 0 : i32
    return %c0_i32, %c0_i32_0 : i32, i32
  }
  func.func @transform_6(%arg0: i32) -> (i32, i32) {
    %c0_i32 = arith.constant 0 : i32
    %c0_i32_0 = arith.constant 0 : i32
    %c0_i32_1 = arith.constant 0 : i32
    return %c0_i32, %c0_i32_0 : i32, i32
  }
  func.func @transform_7(%arg0: i32) -> (i32, i32) {
    %c0_i32 = arith.constant 0 : i32
    %c0_i32_0 = arith.constant 0 : i32
    %c0_i32_1 = arith.constant 0 : i32
    return %c0_i32, %c0_i32_0 : i32, i32
  }
  func.func @transform_8(%arg0: i32) -> (i32, i32, i32) {
    %c0_i32 = arith.constant 0 : i32
    %c0_i32_0 = arith.constant 0 : i32
    %c0_i32_1 = arith.constant 0 : i32
    return %arg0, %c0_i32, %c0_i32_0 : i32, i32, i32
  }
}

</mosaic_0001>

<bundles_post_ra>
// kernel: tpu_custom_call.1
= control target key start
LH: loop header
LB: loop body
LE: loop exit
PB: predicated region body
PF: predicated region fallthrough
CT: control target
= control target key end

     0   :  { %13 = vsyncpa [#allocation5], 0  ;;  %s2250_s0 = inlined_call_operand.vmem [shape: bf16[2,8,32], index: 0, kind: input, shape index: {}]   ;;  %s2251_s1 = inlined_call_operand.hbm [shape: bf16[32,256], index: 1, kind: input, shape index: {}]   ;;  %s2252_s2 = inlined_call_operand.vmem [shape: f32[1,256], index: 2, kind: input, shape index: {}]   ;;  %s2253_s3 = inlined_call_operand.vmem [shape: bf16[64,256], index: 3, kind: input, shape index: {}]   ;;  %s2254_s4 = inlined_call_operand.vmem [shape: bf16[64,50], index: 4, kind: input, shape index: {}]   ;;  %s2255_s5 = inlined_call_operand.vmem [shape: f32[1,50], index: 5, kind: input, shape index: {}]   ;;  %s2256_s6 = inlined_call_operand.vmem [shape: bf16[2,50], index: 6, kind: input, shape index: {}]   ;;  %s2257_s7 = inlined_call_operand.vmem [shape: f32[2,1], index: 7, kind: input, shape index: {}]   ;;  %s2258_s8 = inlined_call_operand.hbm [shape: f32[2,2,8], index: 8, kind: output, shape index: {}]  }
   0x1   :  { %14 = vsyncpa [#allocation6], 0 }
   0x2   :  { %16 = vsyncpa [#allocation6 + $0x1], 0  ;;  %s1907_s27 = smov 0   ;;  %s1909_s28 = smov 0  }
   0x3   :  { %s1911_s29 = smov 0   ;;  %s1913_s30 = smov 0  }
   0x4 LB: > { %s1928_s9 = sadd.s32 4294967295, %s1851_s30   ;;  %s1497_s10 = sadd.s32 4294967294, %s1851_s30   ;;  %s1851_s30 = sphi %s1913_s30, %s2274_s30   ;;  %s1847_s29 = sphi %s1911_s29, %s2273_s29   ;;  %s1843_s28 = sphi %s1909_s28, %s2272_s28   ;;  %s1839_s27 = sphi %s1907_s27, %s2271_s27  }
   0x5   : > { %s1932_s11 = sadd.s32 1, %s1851_s30   ;;  %s202_s12 = sadd.s32 1, %s1847_s29 }
   0x6   : > { %s199_s13 = ssub.s32 %s1851_s30, %s1932_s11  ;;  %p212_p0 = scmp.ne.s32.totalorder %s1847_s29, %s1843_s28 }
   0x7   : > { %p200_p1 = scmp.eq.s32.totalorder %s199_s13, 0  ;;  %p213_p2 = scmp.eq.s32.totalorder %s1928_s9, 1 }
   0x8   : > { %p218_p3 = scmp.ne.s32.totalorder %s1843_s28, %s1839_s27  ;;  %p219_p4 = scmp.eq.s32.totalorder %s1497_s10, 1 }
   0x9   : > { %s1943_s14 = scalar_select %p200_p1, %s1847_s29, %s202_s12  }
   0xa   : > { %p1945_p5 = por %p213_p2, %p212_p0  ;;  %p1949_p6 = por %p219_p4, %p218_p3 }
   0xb   : > { %p1498_p7 = scmp.ge.s32.totalorder %s1851_s30, 1  ;;  %p226_p8 = scmp.lt.s32.totalorder %s1851_s30, 3 }
   0xc   : > { %s2262_s15 = scalar_select %p1945_p5, 1, 0 }
   0xd   : > { %s2263_s16 = scalar_select %p1949_p6, 1, 0 }
   0xe   : > { %p2259_p9 = scmp.eq.s32.totalorder %s1928_s9, 0  ;;  %p1956_p10 = pnand %p1498_p7, %p226_p8 }
   0xf   : > { %s1853_s18 = smov [#allocation4]   ;;  %s1757_s23 = scalar_lea.hbm %s2251_s1, 512 }
  0x10   : > { %s2264_s17 = scalar_select %p1956_p10, 1, 0 }
  0x11   : > { %s238_s19 = sshll.u32 %s1853_s18, 4  ;;  %p1583_p11 = pneg %p1956_p10  ;;  %s239_s19 = int_to_ptr.vmem [resolvable:$true] %s238_s19 }
  0x12   : > { %p1758_p13 = scmp.ne.s32.totalorder %s2251_s1, %s1757_s23  ;;  %p1764_p3 = scmp.lt.u32.totalorder %s1757_s23, %s2251_s1 }
  0x13   : > { %p1964_p12 = pnand %p2259_p9, %p1583_p11 }
  0x15   : > { %p1759_p0 = pneg %p1964_p12 }
  0x17   : > { %p1760_p1 = pnand %p1759_p0, %p1758_p13 }
  0x19   : > { %p1761_p2 = pneg %p1760_p1 }
  0x1b   : > { %p1766_p4 = pnand %p1764_p3, %p1761_p2 }
  0x1d   : > { %1769 = shalt.err (!%p1766_p4)
}
  0x1e   : > { %s1770_s12 = scalar_lea.vmem %s239_s19, 512  ;;  %p1778_p9 = scmp.lt.s32.totalorder %s239_s19, %s239_s19 }
  0x1f   : > { %p1771_p7 = scmp.ne.s32.totalorder %s239_s19, %s1770_s12  ;;  %p1779_p6 = scmp.lt.s32.totalorder %s1770_s12, %s1770_s12 }
  0x21   : > { %p1773_p8 = pnand %p1771_p7, %p1759_p0  ;;  %p1780_p5 = por %p1779_p6, %p1778_p9 }
  0x23   : > { %p1774_p11 = pneg %p1773_p8 }
  0x25   : > { %p1781_p10 = pnand %p1780_p5, %p1774_p11 }
  0x27   : > { %1784 = shalt.err (!%p1781_p10)
}
  0x28   : > { %s1854_s13 = smov 128   ;;  %s1855_s18 = smov 8  }
  0x29   : > { %1586 = dma.hbm_to_vmem [thread:$0]  (!%p1964_p12), %s2251_s1, 512, %s239_s19, [#allocation5], %s1854_s13, %s1854_s13, %s1855_s18  }
  0x2a   : > { %p2266_p13 = scmp.ne.s32.totalorder %s2264_s17, 0 }
  0x2b   : > { %p2267_p1 = scmp.eq.s32.totalorder (!%p2266_p13), %s1928_s9, 0 }
  0x2c   : > { %279 = sbr.rel (%p2266_p13) target bundleno = 4817 (0x12d1), region = 52 }
  0x33   : > { %1830 = dma.done.wait (%p2267_p1), [#allocation5], 512   ;;  %p2268_p0 = pmov %p2267_p1 }
  0x34   : > { %p312_p5 = scmp.lt.s32.totalorder %s1928_s9, 1  ;;  %v1856_v0 = vmov 0   ;;  %v1998_v1 = vld [vmem:[%s2253_s3 + $0x4] ss:$8 sps:$4 sm:$0xff]   ;;  %v2004_v3 = vld [vmem:[%s2253_s3] ss:$8 sps:$4 sm:$0xff]   ;;  %v324_v14 = vlaneseq }
  0x35   : > { %1832 = vsyncadd (%p2268_p0), [#allocation5], 4294966784  ;;  %390 = vmatprep.mubr.bf16.mxu0 %v1856_v0  ;;  %486 = vmatprep.mubr.bf16.mxu1 %v1856_v0  ;;  %v1637_v2 = vld [vmem:[#allocation4 + $0x4] ss:$8 sps:$4 sm:$0xff]   ;;  %v1640_v4 = vld [vmem:[#allocation4] ss:$8 sps:$4 sm:$0xff]  }
  0x36   : > { %1634 = vset.pattern.permute.xlu0 %v1856_v0  ;;  %s313_s19 = scalar_select %p312_p5, %s1928_s9, 1  ;;  %454 = vmatprep.subr.bf16.mxu1 %v1998_v1  ;;  %v2009_v5 = vld [vmem:[%s2253_s3 + $0x14] ss:$8 sps:$4 sm:$0xff]   ;;  %v2015_v7 = vld [vmem:[%s2253_s3 + $0x10] ss:$8 sps:$4 sm:$0xff]   ;;  %vm354_vm0 = vcmask 261120  }
  0x37   : > { %358 = vmatprep.subr.bf16.mxu0 %v1637_v2  ;;  %455 = vmatpush1.bf16.msra.mxu1 %v2004_v3  ;;  %v1643_v6 = vld [vmem:[#allocation4 + $0x14] ss:$8 sps:$4 sm:$0xff]   ;;  %v1646_v8 = vld [vmem:[#allocation4 + $0x10] ss:$8 sps:$4 sm:$0xff]   ;;  %v325_v15 = vshrl.u32 %v324_v14, 7  ;;  %s1858_s18 = smov 64  }
  0x38   : > { %s1504_s23 = sshll.u32 %s313_s19, 2  ;;  %359 = vmatpush1.bf16.msra.mxu0 %v1640_v4  ;;  %456 = vmatprep.subr.bf16.mxu1 %v2009_v5  ;;  %v2024_v9 = vld [vmem:[%s2253_s3 + $0x24] ss:$8 sps:$4 sm:$0xff]   ;;  %v2030_v11 = vld [vmem:[%s2253_s3 + $0x20] ss:$8 sps:$4 sm:$0xff]   ;;  %vm547_vm1 = vcmask 253952  }
  0x39   : > { %s315_s22 = scalar_lea.vmem %s2250_s0, %s1504_s23  ;;  %360 = vmatprep.subr.bf16.mxu0 %v1643_v6  ;;  %v2035_v12 = vld [vmem:[%s2253_s3 + $0x34] ss:$8 sps:$4 sm:$0xff]   ;;  %v2043_v13 = vld [vmem:[%s2253_s3 + $0x30] ss:$8 sps:$4 sm:$0xff]   ;;  %v326_v16 = vsub.s32 0, %v325_v15  ;;  %v330_v18 = vsub.s32 1, %v325_v15 }
  0x3a   : > { %v317_v10 = vld [vmem:[%s315_s22] sm:$0xf]  ;;  %v1857_v22 = vmov 1966171168   ;;  %vm549_vm2 = vcmask 516352   ;;  %vm450_vm3 = vcmask 523264  }
  0x3b   : > { %457 = vmatpush1.bf16.msra.mxu1 %v2015_v7  ;;  %v322_v17 = vld [vmem:[%s2252_s2] sm:$0x3]  ;;  %v499_v23 = vunpack.c.l.s4 %v1857_v22  ;;  %vm1860_vm4 = vmmov 0   ;;  %vm1351_vm5 = vcmask 408576   ;;  %vm1398_vm6 = vcmask 58368   ;;  %s309_s22 = sand.u32 1, %s1843_s28  }
  0x3c   : > { %361 = vmatpush1.bf16.msra.mxu0 %v1646_v8  ;;  %458 = vmatprep.subr.bf16.mxu1 %v2024_v9  ;;  %v327_v19 = vrot.slane %v322_v17, %v326_v16  ;;  %v331_v20 = vrot.slane %v322_v17, %v330_v18  ;;  %s1503_s19 = sshll.u32 %s309_s22, 1  ;;  %s1549_s20 = sshll.u32 %s1928_s9, 5 }
  0x3d   : > { %557 = vmatprep.subr.bf16.mxu0 %v1998_v1  ;;  %v500_v29 = vunpack.c.0.s8 %v499_v23  ;;  %s311_s17 = scalar_lea.vmem [#allocation7], %s1503_s19  ;;  %s2207_s26 = scalar_lea.hbm %s2258_s8, %s1549_s20 }
  0x3e   : > { %s1426_s24 = sshll.u32 %s311_s17, 4  ;;  %s1413_s10 = scalar_lea.sflag [#allocation6], %s309_s22  ;;  %s2209_s24 = int_to_ptr.vmem [resolvable:$true] %s1426_s24 }
  0x3f   : > { %1509 = vmatmul.mubr.msk.bf16.vlgmr.msra.gmra.mrb[0].mxu0 %vm354_vm0, %v317_v10  ;;  %459 = vmatpush1.bf16.msra.mxu1 %v2030_v11  ;;  %v2070_v30 = vsub.s32 %v500_v29, %v325_v15  ;;  %s1785_s12 = scalar_lea.vmem %s2209_s24, 32  ;;  %p2269_p9 = scmp.ne.s32.totalorder %s2262_s15, 0 }
  0x40   : > { %558 = vmatpush1.bf16.msra.mxu0 %v2004_v3  ;;  %460 = vmatprep.subr.bf16.mxu1 %v2035_v12  ;;  %p1786_p6 = scmp.ne.s32.totalorder %s2209_s24, %s1785_s12  ;;  %s1861_s9 = smov [#allocation7]  }
  0x41   : > { %559 = vmatprep.subr.bf16.mxu0 %v2009_v5  ;;  %589 = vmatprep.mubr.bf16.mxu0 %v1856_v0  ;;  %s1789_s13 = sshll.u32 %s1861_s9, 4  ;;  %s1790_s13 = int_to_ptr.vmem [resolvable:$false] %s1789_s13 }
  0x42   : > { %p1787_p10 = pnand %p1786_p6, %p2269_p9  ;;  %p1792_p2 = scmp.lt.s32.totalorder %s2209_s24, %s1790_s13 }
  0x43   : > { %461 = vmatpush1.bf16.msra.mxu1 %v2043_v13 }
  0x44   : > { %560 = vmatpush1.bf16.msra.mxu0 %v2015_v7  ;;  %658 = vmatprep.subr.bf16.mxu1 %v1998_v1  ;;  %p1788_p12 = pneg %p1787_p10 }
  0x45   : > { %561 = vmatprep.subr.bf16.mxu0 %v2024_v9 }
  0x46   : > { %487 = vmatmul.mubr.bf16.vlgmr.msra.gmra.mrb[0].mxu1 %v1856_v0 }
  0x47   : > { %659 = vmatpush1.bf16.msra.mxu1 %v2004_v3  ;;  %690 = vmatprep.mubr.bf16.mxu1 %v1856_v0 }
  0x48   : > { %562 = vmatpush1.bf16.msra.mxu0 %v2030_v11  ;;  %660 = vmatprep.subr.bf16.mxu1 %v2009_v5 }
  0x49   : > { %563 = vmatprep.subr.bf16.mxu0 %v2035_v12 }
  0x4b   : > { %661 = vmatpush1.bf16.msra.mxu1 %v2015_v7 }
  0x4c   : > { %564 = vmatpush1.bf16.msra.mxu0 %v2043_v13  ;;  %662 = vmatprep.subr.bf16.mxu1 %v2024_v9 }
  0x4d   : > { %759 = vmatprep.subr.bf16.mxu0 %v1998_v1 }
  0x4f   : > { %663 = vmatpush1.bf16.msra.mxu1 %v2030_v11 }
  0x50   : > { %664 = vmatprep.subr.bf16.mxu1 %v2035_v12 }
  0x53   : > { %665 = vmatpush1.bf16.msra.mxu1 %v2043_v13 }
  0x54   : > { %860 = vmatprep.subr.bf16.mxu1 %v1998_v1 }
 0x112   : > { %v392_v21 = vpop.f32.mrb[0].mxu0 }
 0x113   : > { %v393_v24 = vadd.f32 %v392_v21, %v327_v19  ;;  %v394_v25 = vpop.f32.mrb[1].mxu0 }
 0x114   : > { %v395_v26 = vadd.f32 %v394_v25, %v331_v20  ;;  %v396_v27 = vpop.f32.mrb[2].mxu0 }
 0x115   : > { %399 = vst [vmem:[#allocation2] sm:$0xff] %v393_v24  ;;  %v397_v28 = vpop.f32.mrb[3].mxu0 }
 0x116   : > { %400 = vst [vmem:[#allocation2 + $0x8] sm:$0xff] %v395_v26 }
 0x119   : > { %v488_v31 = vpop.f32.mrb[0].mxu1 }
 0x11a   : > { %v490_v32 = vpop.f32.mrb[1].mxu1 }
 0x11b   : > { %v497_v33 = vcombine.low %v488_v31, %v490_v32  ;;  %v492_v34 = vpop.f32.mrb[2].mxu1 }
 0x11c   : > { %v493_v35 = vpop.f32.mrb[3].mxu1 }
 0x11d   : > { %v504_v36 = vrot.slane %v497_v33, %v2070_v30  ;;  %v409_v37 = vld [vmem:[#allocation2] ss:$8 sm:$0x3]  ;;  %v552_v8 = vld [vmem:[#allocation2 + $0x1] ss:$8 sm:$0x3] }
 0x11f   : > { %v511_v38 = vrot.slane %v504_v36, %v2070_v30 }
 0x121   : > { %v513_v39 = vadd.f32 %v511_v38, %v409_v37 }
 0x123   : > { %v1518_v40 = vmul.f32 -1.442695, %v513_v39  ;;  %v521_v41 = vrot.slane %v513_v39, 1 }
 0x125   : > { %1657 = vpow2.f32 %v1518_v40 }
 0x126   : > { %1659 = vtanh.f32 %v521_v41 }
 0x12f   : > { %v1658_v42 = vpop.eup %1657 }
 0x130   : > { %v517_v43 = vadd.f32 1.0, %v1658_v42  ;;  %v1660_v44 = vpop.eup %1659  ;;  %v653_v42 = vld [vmem:[#allocation2 + $0x2] ss:$8 sm:$0x3] }
 0x132   : > { %1661 = vrcp.f32 %v517_v43 }
 0x13c   : > { %v1662_v45 = vpop.eup %1661 }
 0x13d   : > { %v535_v46 = vmul.f32 %v1662_v45, %v1660_v44  ;;  %v534_v47 = vmul.f32 0.0, %v1662_v45 }
 0x13f   : > { %537 = vrot.lane.b32.xlu0 %v535_v46, %s1858_s18 }
 0x143   : > { %524 = vrot.lane.b32.xlu0 %v513_v39, %s1858_s18 }
 0x1b1   : > { %v538_v48 = vpop.permute.xlu0 %537 }
 0x1b2   : > { %v540_v49 = vadd.f32 %v538_v48, %v534_v47 }
 0x1b4   : > { %1663 = vtanh.f32 %v540_v49 }
 0x1b5   : > { %v525_v51 = vpop.permute.xlu0 %524 }
 0x1b6   : > { %v526_v52 = vrot.slane %v525_v51, 1 }
 0x1b8   : > { %v1519_v53 = vmul.f32 -1.442695, %v526_v52 }
 0x1ba   : > { %1665 = vpow2.f32 %v1519_v53 }
 0x1be   : > { %v1664_v50 = vpop.eup %1663 }
 0x1bf   : > { %543 = vrot.lane.b32.xlu1 %v1664_v50, %s1858_s18 }
 0x1c4   : > { %v1666_v54 = vpop.eup %1665 }
 0x1c5   : > { %v531_v55 = vadd.f32 1.0, %v1666_v54 }
 0x1c7   : > { %1667 = vrcp.f32 %v531_v55 }
 0x1d1   : > { %v1668_v56 = vpop.eup %1667 }
 0x231   : > { %v544_v57 = vpop.permute.xlu1 %543 }
 0x232   : > { %v546_v58 = vmul.f32 %v1668_v56, %v544_v57 }
 0x234   : > { %548 = vst.msk [vmem:[#allocation3] sm:$0x1] %vm547_vm1, %v546_v58  ;;  %v553_v59 = vpack.c.bf16 %v546_v58, %v546_v58 }
 0x235   : > { %550 = vst.msk [vmem:[#allocation3 + $0x7] sm:$0x1] %vm549_vm2, %v546_v58 }
 0x236   : > { %1520 = vmatmul.mubr.msk.bf16.vlgmr.msra.gmra.mrb[4].mxu0 %vm450_vm3, %v553_v59 }
 0x237   : > { %760 = vmatpush1.bf16.msra.mxu0 %v2004_v3  ;;  %791 = vmatprep.mubr.bf16.mxu0 %v1856_v0 }
 0x238   : > { %761 = vmatprep.subr.bf16.mxu0 %v2009_v5 }
 0x23b   : > { %762 = vmatpush1.bf16.msra.mxu0 %v2015_v7 }
 0x23c   : > { %763 = vmatprep.subr.bf16.mxu0 %v2024_v9 }
 0x23f   : > { %764 = vmatpush1.bf16.msra.mxu0 %v2030_v11 }
 0x240   : > { %765 = vmatprep.subr.bf16.mxu0 %v2035_v12 }
 0x243   : > { %766 = vmatpush1.bf16.msra.mxu0 %v2043_v13 }
 0x244   : > { %961 = vmatprep.subr.bf16.mxu0 %v1998_v1 }
 0x309   : > { %v591_v60 = vpop.f32.mrb[4].mxu0 }
 0x30a   : > { %v593_v61 = vpop.f32.mrb[5].mxu0 }
 0x30b   : > { %v600_v62 = vcombine.low %v591_v60, %v593_v61  ;;  %v595_v63 = vpop.f32.mrb[6].mxu0 }
 0x30c   : > { %v596_v2 = vpop.f32.mrb[7].mxu0 }
 0x30d   : > { %v607_v4 = vrot.slane %v600_v62, %v2070_v30 }
 0x30f   : > { %v614_v6 = vrot.slane %v607_v4, %v2070_v30 }
 0x311   : > { %v616_v10 = vadd.f32 %v614_v6, %v552_v8 }
 0x313   : > { %627 = vrot.lane.b32.xlu0 %v616_v10, %s1858_s18  ;;  %v1521_v14 = vmul.f32 -1.442695, %v616_v10  ;;  %v624_v15 = vrot.slane %v616_v10, 1 }
 0x315   : > { %1669 = vpow2.f32 %v1521_v14 }
 0x316   : > { %1671 = vtanh.f32 %v624_v15 }
 0x31f   : > { %v1670_v16 = vpop.eup %1669 }
 0x320   : > { %v620_v17 = vadd.f32 1.0, %v1670_v16  ;;  %v1672_v18 = vpop.eup %1671  ;;  %v754_v16 = vld [vmem:[#allocation2 + $0x3] ss:$8 sm:$0x3] }
 0x322   : > { %1673 = vrcp.f32 %v620_v17 }
 0x32c   : > { %v1674_v19 = vpop.eup %1673 }
 0x32d   : > { %v638_v20 = vmul.f32 %v1674_v19, %v1672_v18  ;;  %v637_v21 = vmul.f32 %v1674_v19, %v540_v49 }
 0x32f   : > { %640 = vrot.lane.b32.xlu1 %v638_v20, %s1858_s18 }
 0x385   : > { %v628_v25 = vpop.permute.xlu0 %627 }
 0x386   : > { %v629_v26 = vrot.slane %v628_v25, 1 }
 0x388   : > { %v1522_v27 = vmul.f32 -1.442695, %v629_v26 }
 0x3a1   : > { %v641_v22 = vpop.permute.xlu1 %640 }
 0x3a2   : > { %v643_v23 = vadd.f32 %v641_v22, %v637_v21 }
 0x3a4   : > { %1675 = vtanh.f32 %v643_v23 }
 0x3a5   : > { %1677 = vpow2.f32 %v1522_v27 }
 0x3ae   : > { %v1676_v24 = vpop.eup %1675 }
 0x3af   : > { %646 = vrot.lane.b32.xlu1 %v1676_v24, %s1858_s18  ;;  %v1678_v28 = vpop.eup %1677 }
 0x3b0   : > { %v634_v29 = vadd.f32 1.0, %v1678_v28 }
 0x3b2   : > { %1679 = vrcp.f32 %v634_v29 }
 0x3bc   : > { %v1680_v31 = vpop.eup %1679 }
 0x421   : > { %v647_v32 = vpop.permute.xlu1 %646 }
 0x422   : > { %v649_v33 = vmul.f32 %v1680_v31, %v647_v32 }
 0x424   : > { %650 = vst.msk [vmem:[#allocation3 + $0x1] sm:$0x1] %vm547_vm1, %v649_v33  ;;  %v654_v34 = vpack.c.bf16 %v649_v33, %v649_v33 }
 0x425   : > { %651 = vst.msk [vmem:[#allocation3 + $0x6] sm:$0x1] %vm549_vm2, %v649_v33 }
 0x426   : > { %1523 = vmatmul.mubr.msk.bf16.vlgmr.msra.gmra.mrb[4].mxu1 %vm450_vm3, %v654_v34 }
 0x427   : > { %861 = vmatpush1.bf16.msra.mxu1 %v2004_v3  ;;  %892 = vmatprep.mubr.bf16.mxu1 %v1856_v0 }
 0x428   : > { %862 = vmatprep.subr.bf16.mxu1 %v2009_v5 }
 0x42b   : > { %863 = vmatpush1.bf16.msra.mxu1 %v2015_v7 }
 0x42c   : > { %864 = vmatprep.subr.bf16.mxu1 %v2024_v9 }
 0x42f   : > { %865 = vmatpush1.bf16.msra.mxu1 %v2030_v11 }
 0x430   : > { %866 = vmatprep.subr.bf16.mxu1 %v2035_v12 }
 0x433   : > { %867 = vmatpush1.bf16.msra.mxu1 %v2043_v13 }
 0x434   : > { %1062 = vmatprep.subr.bf16.mxu1 %v1998_v1 }
 0x4f9   : > { %v692_v35 = vpop.f32.mrb[4].mxu1 }
 0x4fa   : > { %v694_v36 = vpop.f32.mrb[5].mxu1 }
 0x4fb   : > { %v701_v37 = vcombine.low %v692_v35, %v694_v36  ;;  %v696_v38 = vpop.f32.mrb[6].mxu1 }
 0x4fc   : > { %v697_v39 = vpop.f32.mrb[7].mxu1 }
 0x4fd   : > { %v708_v40 = vrot.slane %v701_v37, %v2070_v30 }
 0x4ff   : > { %v715_v41 = vrot.slane %v708_v40, %v2070_v30 }
 0x501   : > { %v717_v43 = vadd.f32 %v715_v41, %v653_v42 }
 0x503   : > { %728 = vrot.lane.b32.xlu1 %v717_v43, %s1858_s18  ;;  %v1524_v44 = vmul.f32 -1.442695, %v717_v43  ;;  %v725_v45 = vrot.slane %v717_v43, 1 }
 0x505   : > { %1681 = vpow2.f32 %v1524_v44 }
 0x506   : > { %1683 = vtanh.f32 %v725_v45  ;;  %v855_v45 = vld [vmem:[#allocation2 + $0x4] ss:$8 sm:$0x3] }
 0x50f   : > { %v1682_v46 = vpop.eup %1681 }
 0x510   : > { %v721_v47 = vadd.f32 1.0, %v1682_v46  ;;  %v1684_v48 = vpop.eup %1683 }
 0x512   : > { %1685 = vrcp.f32 %v721_v47 }
 0x51c   : > { %v1686_v49 = vpop.eup %1685 }
 0x51d   : > { %v739_v50 = vmul.f32 %v1686_v49, %v1684_v48  ;;  %v738_v51 = vmul.f32 %v1686_v49, %v643_v23 }
 0x51f   : > { %741 = vrot.lane.b32.xlu0 %v739_v50, %s1858_s18 }
 0x575   : > { %v729_v55 = vpop.permute.xlu1 %728 }
 0x576   : > { %v730_v56 = vrot.slane %v729_v55, 1 }
 0x578   : > { %v1525_v57 = vmul.f32 -1.442695, %v730_v56 }
 0x591   : > { %v742_v52 = vpop.permute.xlu0 %741 }
 0x592   : > { %v744_v53 = vadd.f32 %v742_v52, %v738_v51 }
 0x594   : > { %1687 = vtanh.f32 %v744_v53 }
 0x595   : > { %1689 = vpow2.f32 %v1525_v57 }
 0x59e   : > { %v1688_v54 = vpop.eup %1687 }
 0x59f   : > { %747 = vrot.lane.b32.xlu0 %v1688_v54, %s1858_s18  ;;  %v1690_v58 = vpop.eup %1689 }
 0x5a0   : > { %v735_v59 = vadd.f32 1.0, %v1690_v58 }
 0x5a2   : > { %1691 = vrcp.f32 %v735_v59 }
 0x5ac   : > { %v1692_v60 = vpop.eup %1691 }
 0x611   : > { %v748_v61 = vpop.permute.xlu0 %747 }
 0x612   : > { %v750_v62 = vmul.f32 %v1692_v60, %v748_v61 }
 0x614   : > { %751 = vst.msk [vmem:[#allocation3 + $0x2] sm:$0x1] %vm547_vm1, %v750_v62  ;;  %v755_v63 = vpack.c.bf16 %v750_v62, %v750_v62 }
 0x615   : > { %752 = vst.msk [vmem:[#allocation3 + $0x5] sm:$0x1] %vm549_vm2, %v750_v62 }
 0x616   : > { %1526 = vmatmul.mubr.msk.bf16.vlgmr.msra.gmra.mrb[8].mxu0 %vm450_vm3, %v755_v63 }
 0x617   : > { %962 = vmatpush1.bf16.msra.mxu0 %v2004_v3  ;;  %993 = vmatprep.mubr.bf16.mxu0 %v1856_v0 }
 0x618   : > { %963 = vmatprep.subr.bf16.mxu0 %v2009_v5 }
 0x61b   : > { %964 = vmatpush1.bf16.msra.mxu0 %v2015_v7 }
 0x61c   : > { %965 = vmatprep.subr.bf16.mxu0 %v2024_v9 }
 0x61f   : > { %966 = vmatpush1.bf16.msra.mxu0 %v2030_v11 }
 0x620   : > { %967 = vmatprep.subr.bf16.mxu0 %v2035_v12 }
 0x623   : > { %968 = vmatpush1.bf16.msra.mxu0 %v2043_v13 }
 0x624   : > { %1163 = vmatprep.subr.bf16.mxu0 %v1998_v1 }
 0x6e9   : > { %v793_v2 = vpop.f32.mrb[8].mxu0 }
 0x6ea   : > { %v795_v4 = vpop.f32.mrb[9].mxu0 }
 0x6eb   : > { %v802_v6 = vcombine.low %v793_v2, %v795_v4  ;;  %v797_v8 = vpop.f32.mrb[10].mxu0 }
 0x6ec   : > { %v798_v10 = vpop.f32.mrb[11].mxu0 }
 0x6ed   : > { %v809_v14 = vrot.slane %v802_v6, %v2070_v30 }
 0x6ef   : > { %v816_v15 = vrot.slane %v809_v14, %v2070_v30 }
 0x6f1   : > { %v818_v17 = vadd.f32 %v816_v15, %v754_v16 }
 0x6f3   : > { %829 = vrot.lane.b32.xlu0 %v818_v17, %s1858_s18  ;;  %v1527_v18 = vmul.f32 -1.442695, %v818_v17  ;;  %v826_v19 = vrot.slane %v818_v17, 1 }
 0x6f5   : > { %1693 = vpow2.f32 %v1527_v18 }
 0x6f6   : > { %1695 = vtanh.f32 %v826_v19 }
 0x6ff   : > { %v1694_v20 = vpop.eup %1693 }
 0x700   : > { %v822_v21 = vadd.f32 1.0, %v1694_v20  ;;  %v1696_v1 = vpop.eup %1695 }
 0x702   : > { %1697 = vrcp.f32 %v822_v21 }
 0x70c   : > { %v1698_v22 = vpop.eup %1697 }
 0x70d   : > { %v840_v23 = vmul.f32 %v1698_v22, %v1696_v1  ;;  %v839_v24 = vmul.f32 %v1698_v22, %v744_v53 }
 0x70f   : > { %842 = vrot.lane.b32.xlu1 %v840_v23, %s1858_s18 }
 0x765   : > { %v830_v28 = vpop.permute.xlu0 %829 }
 0x766   : > { %v831_v29 = vrot.slane %v830_v28, 1 }
 0x768   : > { %v1528_v31 = vmul.f32 -1.442695, %v831_v29 }
 0x781   : > { %v843_v25 = vpop.permute.xlu1 %842 }
 0x782   : > { %v845_v26 = vadd.f32 %v843_v25, %v839_v24 }
 0x784   : > { %1699 = vtanh.f32 %v845_v26 }
 0x785   : > { %1701 = vpow2.f32 %v1528_v31 }
 0x78e   : > { %v1700_v27 = vpop.eup %1699 }
 0x78f   : > { %848 = vrot.lane.b32.xlu1 %v1700_v27, %s1858_s18  ;;  %v1702_v32 = vpop.eup %1701 }
 0x790   : > { %v836_v33 = vadd.f32 1.0, %v1702_v32 }
 0x792   : > { %1703 = vrcp.f32 %v836_v33 }
 0x79c   : > { %v1704_v34 = vpop.eup %1703 }
 0x801   : > { %v849_v35 = vpop.permute.xlu1 %848 }
 0x802   : > { %v851_v36 = vmul.f32 %v1704_v34, %v849_v35 }
 0x804   : > { %852 = vst.msk [vmem:[#allocation3 + $0x3] sm:$0x1] %vm547_vm1, %v851_v36  ;;  %v856_v37 = vpack.c.bf16 %v851_v36, %v851_v36 }
 0x805   : > { %853 = vst.msk [vmem:[#allocation3 + $0x4] sm:$0x1] %vm549_vm2, %v851_v36 }
 0x806   : > { %1529 = vmatmul.mubr.msk.bf16.vlgmr.msra.gmra.mrb[8].mxu1 %vm450_vm3, %v856_v37 }
 0x807   : > { %1063 = vmatpush1.bf16.msra.mxu1 %v2004_v3  ;;  %1094 = vmatprep.mubr.bf16.mxu1 %v1856_v0 }
 0x808   : > { %1064 = vmatprep.subr.bf16.mxu1 %v2009_v5 }
 0x80b   : > { %1065 = vmatpush1.bf16.msra.mxu1 %v2015_v7 }
 0x80c   : > { %1066 = vmatprep.subr.bf16.mxu1 %v2024_v9 }
 0x80f   : > { %1067 = vmatpush1.bf16.msra.mxu1 %v2030_v11 }
 0x810   : > { %1068 = vmatprep.subr.bf16.mxu1 %v2035_v12 }
 0x813   : > { %1069 = vmatpush1.bf16.msra.mxu1 %v2043_v13 }
 0x8d9   : > { %v894_v38 = vpop.f32.mrb[8].mxu1 }
 0x8da   : > { %v896_v39 = vpop.f32.mrb[9].mxu1 }
 0x8db   : > { %v903_v40 = vcombine.low %v894_v38, %v896_v39  ;;  %v898_v41 = vpop.f32.mrb[10].mxu1 }
 0x8dc   : > { %v899_v42 = vpop.f32.mrb[11].mxu1 }
 0x8dd   : > { %v910_v43 = vrot.slane %v903_v40, %v2070_v30  ;;  %v1057_v40 = vld [vmem:[#allocation2 + $0x6] ss:$8 sm:$0x3] }
 0x8df   : > { %v917_v44 = vrot.slane %v910_v43, %v2070_v30 }
 0x8e1   : > { %v919_v46 = vadd.f32 %v917_v44, %v855_v45 }
 0x8e3   : > { %930 = vrot.lane.b32.xlu1 %v919_v46, %s1858_s18  ;;  %v1530_v47 = vmul.f32 -1.442695, %v919_v46  ;;  %v927_v48 = vrot.slane %v919_v46, 1 }
 0x8e5   : > { %1705 = vpow2.f32 %v1530_v47 }
 0x8e6   : > { %1707 = vtanh.f32 %v927_v48 }
 0x8ef   : > { %v1706_v49 = vpop.eup %1705 }
 0x8f0   : > { %v923_v50 = vadd.f32 1.0, %v1706_v49  ;;  %v1708_v51 = vpop.eup %1707 }
 0x8f2   : > { %1709 = vrcp.f32 %v923_v50 }
 0x8fc   : > { %v1710_v52 = vpop.eup %1709 }
 0x8fd   : > { %v941_v53 = vmul.f32 %v1710_v52, %v1708_v51  ;;  %v940_v54 = vmul.f32 %v1710_v52, %v845_v26 }
 0x8ff   : > { %943 = vrot.lane.b32.xlu0 %v941_v53, %s1858_s18 }
 0x955   : > { %v931_v58 = vpop.permute.xlu1 %930 }
 0x956   : > { %v932_v59 = vrot.slane %v931_v58, 1 }
 0x958   : > { %v1531_v60 = vmul.f32 -1.442695, %v932_v59 }
 0x971   : > { %v944_v55 = vpop.permute.xlu0 %943 }
 0x972   : > { %v946_v56 = vadd.f32 %v944_v55, %v940_v54 }
 0x974   : > { %1711 = vtanh.f32 %v946_v56 }
 0x975   : > { %1713 = vpow2.f32 %v1531_v60 }
 0x97e   : > { %v1712_v57 = vpop.eup %1711 }
 0x97f   : > { %949 = vrot.lane.b32.xlu0 %v1712_v57, %s1858_s18  ;;  %v1714_v61 = vpop.eup %1713 }
 0x980   : > { %v937_v62 = vadd.f32 1.0, %v1714_v61 }
 0x982   : > { %1715 = vrcp.f32 %v937_v62 }
 0x98c   : > { %v1716_v63 = vpop.eup %1715 }
 0x9f1   : > { %v950_v2 = vpop.permute.xlu0 %949 }
 0x9f2   : > { %v952_v4 = vmul.f32 %v1716_v63, %v950_v2 }
 0x9f4   : > { %953 = vst.msk [vmem:[#allocation3 + $0x4] sm:$0x1] %vm547_vm1, %v952_v4  ;;  %v957_v6 = vpack.c.bf16 %v952_v4, %v952_v4 }
 0x9f5   : > { %954 = vst.msk [vmem:[#allocation3 + $0x3] sm:$0x1] %vm549_vm2, %v952_v4 }
 0x9f6   : > { %1532 = vmatmul.mubr.msk.bf16.vlgmr.msra.gmra.mrb[12].mxu0 %vm450_vm3, %v957_v6 }
 0x9f7   : > { %1164 = vmatpush1.bf16.msra.mxu0 %v2004_v3  ;;  %1195 = vmatprep.mubr.bf16.mxu0 %v1856_v0 }
 0x9f8   : > { %1165 = vmatprep.subr.bf16.mxu0 %v2009_v5  ;;  %v956_v5 = vld [vmem:[#allocation2 + $0x5] ss:$8 sm:$0x3] }
 0x9fb   : > { %1166 = vmatpush1.bf16.msra.mxu0 %v2015_v7 }
 0x9fc   : > { %1167 = vmatprep.subr.bf16.mxu0 %v2024_v9 }
 0x9ff   : > { %1168 = vmatpush1.bf16.msra.mxu0 %v2030_v11 }
 0xa00   : > { %1169 = vmatprep.subr.bf16.mxu0 %v2035_v12 }
 0xa03   : > { %1170 = vmatpush1.bf16.msra.mxu0 %v2043_v13 }
 0xac9   : > { %v995_v8 = vpop.f32.mrb[12].mxu0 }
 0xaca   : > { %v997_v10 = vpop.f32.mrb[13].mxu0 }
 0xacb   : > { %v1004_v14 = vcombine.low %v995_v8, %v997_v10  ;;  %v999_v15 = vpop.f32.mrb[14].mxu0 }
 0xacc   : > { %v1000_v16 = vpop.f32.mrb[15].mxu0 }
 0xacd   : > { %v1011_v3 = vrot.slane %v1004_v14, %v2070_v30  ;;  %v1158_v14 = vld [vmem:[#allocation2 + $0x7] ss:$8 sm:$0x3] }
 0xacf   : > { %v1018_v0 = vrot.slane %v1011_v3, %v2070_v30 }
 0xad1   : > { %v1020_v17 = vadd.f32 %v1018_v0, %v956_v5 }
 0xad3   : > { %1031 = vrot.lane.b32.xlu0 %v1020_v17, %s1858_s18  ;;  %v1533_v7 = vmul.f32 -1.442695, %v1020_v17  ;;  %v1028_v9 = vrot.slane %v1020_v17, 1 }
 0xad5   : > { %1717 = vpow2.f32 %v1533_v7 }
 0xad6   : > { %1719 = vtanh.f32 %v1028_v9 }
 0xadf   : > { %v1718_v11 = vpop.eup %1717 }
 0xae0   : > { %v1024_v12 = vadd.f32 1.0, %v1718_v11  ;;  %v1720_v13 = vpop.eup %1719  ;;  %v1859_v11 = vmov 0.0  }
 0xae1   : > { %1559 = vmatprep.subr.bf16.mxu1 %v1859_v11  ;;  %1571 = vmatprep.subr.bf16.mxu0 %v1859_v11 }
 0xae2   : > { %1721 = vrcp.f32 %v1024_v12 }
 0xaec   : > { %v1722_v18 = vpop.eup %1721 }
 0xaed   : > { %v1042_v19 = vmul.f32 %v1722_v18, %v1720_v13  ;;  %v1041_v20 = vmul.f32 %v1722_v18, %v946_v56 }
 0xaef   : > { %1044 = vrot.lane.b32.xlu1 %v1042_v19, %s1858_s18  ;;  %v1654_v19 = vld [vmem:[%s2254_s4 + $0x8] sm:$0xff]  }
 0xb45   : > { %v1032_v23 = vpop.permute.xlu0 %1031 }
 0xb46   : > { %v1033_v24 = vrot.slane %v1032_v23, 1 }
 0xb48   : > { %v1534_v25 = vmul.f32 -1.442695, %v1033_v24 }
 0xb61   : > { %v1045_v21 = vpop.permute.xlu1 %1044 }
 0xb62   : > { %v1047_v1 = vadd.f32 %v1045_v21, %v1041_v20  ;;  %v1655_v20 = vld [vmem:[%s2254_s4 + $0x10] sm:$0xff]   ;;  %v1656_v21 = vld [vmem:[%s2254_s4 + $0x18] sm:$0xff]  }
 0xb64   : > { %1723 = vtanh.f32 %v1047_v1 }
 0xb65   : > { %1725 = vpow2.f32 %v1534_v25 }
 0xb6e   : > { %v1724_v22 = vpop.eup %1723 }
 0xb6f   : > { %1050 = vrot.lane.b32.xlu1 %v1724_v22, %s1858_s18  ;;  %v1726_v26 = vpop.eup %1725 }
 0xb70   : > { %v1038_v27 = vadd.f32 1.0, %v1726_v26 }
 0xb72   : > { %1727 = vrcp.f32 %v1038_v27 }
 0xb7c   : > { %v1728_v28 = vpop.eup %1727 }
 0xbe1   : > { %v1051_v29 = vpop.permute.xlu1 %1050 }
 0xbe2   : > { %v1053_v31 = vmul.f32 %v1728_v28, %v1051_v29 }
 0xbe4   : > { %1054 = vst.msk [vmem:[#allocation3 + $0x5] sm:$0x1] %vm547_vm1, %v1053_v31  ;;  %v1058_v32 = vpack.c.bf16 %v1053_v31, %v1053_v31 }
 0xbe5   : > { %1055 = vst.msk [vmem:[#allocation3 + $0x2] sm:$0x1] %vm549_vm2, %v1053_v31 }
 0xbe6   : > { %1535 = vmatmul.mubr.msk.bf16.vlgmr.msra.gmra.mrb[12].mxu1 %vm450_vm3, %v1058_v32 }
 0xbe7   : > { %1567 = vmatprep.mubr.msk.bf16.mxu1 %vm1860_vm4, %v1859_v11 }
 0xcb9   : > { %v1096_v33 = vpop.f32.mrb[12].mxu1 }
 0xcba   : > { %v1098_v34 = vpop.f32.mrb[13].mxu1 }
 0xcbb   : > { %v1105_v35 = vcombine.low %v1096_v33, %v1098_v34  ;;  %v1100_v36 = vpop.f32.mrb[14].mxu1  ;;  %v1345_v33 = vld [vmem:[%s2257_s7] sm:$0x3] }
 0xcbc   : > { %v1101_v37 = vpop.f32.mrb[15].mxu1  ;;  %v1541_v34 = vld [vmem:[%s2255_s5] ss:$0 sm:$0xff] }
 0xcbd   : > { %v1112_v38 = vrot.slane %v1105_v35, %v2070_v30 }
 0xcbf   : > { %v1119_v39 = vrot.slane %v1112_v38, %v2070_v30 }
 0xcc1   : > { %v1121_v41 = vadd.f32 %v1119_v39, %v1057_v40 }
 0xcc3   : > { %1132 = vrot.lane.b32.xlu1 %v1121_v41, %s1858_s18  ;;  %v1536_v42 = vmul.f32 -1.442695, %v1121_v41  ;;  %v1129_v43 = vrot.slane %v1121_v41, 1 }
 0xcc5   : > { %1729 = vpow2.f32 %v1536_v42 }
 0xcc6   : > { %1731 = vtanh.f32 %v1129_v43  ;;  %v1343_v43 = vld [vmem:[%s2256_s6] sm:$0x1] }
 0xccf   : > { %v1730_v44 = vpop.eup %1729 }
 0xcd0   : > { %v1125_v45 = vadd.f32 1.0, %v1730_v44  ;;  %v1732_v46 = vpop.eup %1731 }
 0xcd2   : > { %1733 = vrcp.f32 %v1125_v45 }
 0xcdc   : > { %v1734_v47 = vpop.eup %1733 }
 0xcdd   : > { %v1143_v48 = vmul.f32 %v1734_v47, %v1732_v46  ;;  %v1142_v49 = vmul.f32 %v1734_v47, %v1047_v1 }
 0xcdf   : > { %1145 = vrot.lane.b32.xlu0 %v1143_v48, %s1858_s18 }
 0xd35   : > { %v1133_v53 = vpop.permute.xlu1 %1132 }
 0xd36   : > { %v1134_v54 = vrot.slane %v1133_v53, 1 }
 0xd38   : > { %v1537_v55 = vmul.f32 -1.442695, %v1134_v54 }
 0xd51   : > { %v1146_v50 = vpop.permute.xlu0 %1145 }
 0xd52   : > { %v1148_v51 = vadd.f32 %v1146_v50, %v1142_v49 }
 0xd54   : > { %1735 = vtanh.f32 %v1148_v51 }
 0xd55   : > { %1737 = vpow2.f32 %v1537_v55 }
 0xd5e   : > { %v1736_v52 = vpop.eup %1735 }
 0xd5f   : > { %1151 = vrot.lane.b32.xlu0 %v1736_v52, %s1858_s18  ;;  %v1738_v56 = vpop.eup %1737 }
 0xd60   : > { %v1139_v57 = vadd.f32 1.0, %v1738_v56 }
 0xd62   : > { %1739 = vrcp.f32 %v1139_v57 }
 0xd6c   : > { %v1740_v58 = vpop.eup %1739 }
 0xdd1   : > { %v1152_v59 = vpop.permute.xlu0 %1151 }
 0xdd2   : > { %v1154_v60 = vmul.f32 %v1740_v58, %v1152_v59 }
 0xdd4   : > { %1155 = vst.msk [vmem:[#allocation3 + $0x6] sm:$0x1] %vm547_vm1, %v1154_v60  ;;  %v1159_v61 = vpack.c.bf16 %v1154_v60, %v1154_v60 }
 0xdd5   : > { %1156 = vst.msk [vmem:[#allocation3 + $0x1] sm:$0x1] %vm549_vm2, %v1154_v60 }
 0xdd6   : > { %1538 = vmatmul.mubr.msk.bf16.vlgmr.msra.gmra.mrb[16].mxu0 %vm450_vm3, %v1159_v61 }
 0xdd7   : > { %1573 = vmatprep.mubr.msk.bf16.mxu0 %vm1860_vm4, %v1859_v11 }
 0xea9   : > { %v1197_v62 = vpop.f32.mrb[16].mxu0 }
 0xeaa   : > { %v1199_v63 = vpop.f32.mrb[17].mxu0 }
 0xeab   : > { %v1206_v2 = vcombine.low %v1197_v62, %v1199_v63  ;;  %v1201_v4 = vpop.f32.mrb[18].mxu0 }
 0xeac   : > { %v1202_v6 = vpop.f32.mrb[19].mxu0 }
 0xead   : > { %v1213_v8 = vrot.slane %v1206_v2, %v2070_v30 }
 0xeaf   : > { %v1220_v10 = vrot.slane %v1213_v8, %v2070_v30  ;;  %v1653_v30 = vld [vmem:[%s2254_s4] sm:$0xff]  }
 0xeb0   : > { %1560 = vmatpush3.bf16.msra.mxu1 %v1653_v30 }
 0xeb1   : > { %v1222_v15 = vadd.f32 %v1220_v10, %v1158_v14  ;;  %1561 = vmatprep.subr.bf16.mxu1 %v1859_v11 }
 0xeb3   : > { %1233 = vrot.lane.b32.xlu0 %v1222_v15, %s1858_s18  ;;  %v1539_v16 = vmul.f32 -1.442695, %v1222_v15  ;;  %v1230_v3 = vrot.slane %v1222_v15, 1 }
 0xeb4   : > { %1562 = vmatpush3.bf16.msra.mxu1 %v1654_v19 }
 0xeb5   : > { %1741 = vpow2.f32 %v1539_v16  ;;  %1563 = vmatprep.subr.bf16.mxu1 %v1859_v11 }
 0xeb6   : > { %1743 = vtanh.f32 %v1230_v3 }
 0xeb7   : > { %1348 = vperm.xlu0 %1634, %v1345_v33  }
 0xeb8   : > { %1564 = vmatpush3.bf16.msra.mxu1 %v1655_v20 }
 0xeb9   : > { %1565 = vmatprep.subr.bf16.mxu1 %v1859_v11 }
 0xebc   : > { %1566 = vmatpush3.bf16.msra.mxu1 %v1656_v21 }
 0xebf   : > { %v1742_v0 = vpop.eup %1741 }
 0xec0   : > { %v1226_v5 = vadd.f32 1.0, %v1742_v0  ;;  %v1744_v17 = vpop.eup %1743 }
 0xec2   : > { %1745 = vrcp.f32 %v1226_v5 }
 0xecc   : > { %v1746_v7 = vpop.eup %1745 }
 0xecd   : > { %v1244_v9 = vmul.f32 %v1746_v7, %v1744_v17  ;;  %v1243_v12 = vmul.f32 %v1746_v7, %v1148_v51 }
 0xecf   : > { %1246 = vrot.lane.b32.xlu1 %v1244_v9, %s1858_s18 }
 0xf25   : > { %v1234_v22 = vpop.permute.xlu0 %1233 }
 0xf26   : > { %v1235_v23 = vrot.slane %v1234_v22, 1 }
 0xf28   : > { %v1540_v24 = vmul.f32 -1.442695, %v1235_v23 }
 0xf36   : > { %v1349_v44 = vpop.permute.xlu0 %1348 }
 0xf41   : > { %v1247_v13 = vpop.permute.xlu1 %1246 }
 0xf42   : > { %v1249_v18 = vadd.f32 %v1247_v13, %v1243_v12 }
 0xf44   : > { %1747 = vtanh.f32 %v1249_v18 }
 0xf45   : > { %1749 = vpow2.f32 %v1540_v24 }
 0xf4e   : > { %v1748_v1 = vpop.eup %1747 }
 0xf4f   : > { %1252 = vrot.lane.b32.xlu1 %v1748_v1, %s1858_s18  ;;  %v1750_v25 = vpop.eup %1749  ;;  %s1791_s18 = scalar_lea.vmem %s1790_s13, 64 }
 0xf50   : > { %v1240_v26 = vadd.f32 1.0, %v1750_v25  ;;  %p1793_p3 = scmp.lt.s32.totalorder %s1791_s18, %s1785_s12 }
 0xf52   : > { %1751 = vrcp.f32 %v1240_v26  ;;  %p1794_p4 = por %p1793_p3, %p1792_p2 }
 0xf54   : > { %p1795_p7 = pnand %p1794_p4, %p1788_p12 }
 0xf5c   : > { %v1752_v27 = vpop.eup %1751 }
 0xfc1   : > { %v1253_v28 = vpop.permute.xlu1 %1252 }
 0xfc2   : > { %v1255_v29 = vmul.f32 %v1752_v27, %v1253_v28 }
 0xfc4   : > { %1256 = vst.msk [vmem:[#allocation3 + $0x7] sm:$0x1] %vm547_vm1, %v1255_v29 }
 0xfc5   : > { %1257 = vst.msk [vmem:[#allocation3] sm:$0x1] %vm549_vm2, %v1255_v29 }
 0xfcc   : > { %v1258_v31 = vld [vmem:[#allocation3] sm:$0xff] }
 0xfcd   : > { %v1259_v32 = vpack.c.bf16 %v1258_v31, %v1258_v31 }
 0xfcf   : > { %1568 = vmatmul.mubr.msk.bf16.vlgmr.msra.gmra.mrb[16].mxu1 %vm450_vm3, %v1259_v32 }
0x10a2   : > { %v1336_v35 = vpop.f32.mrb[16].mxu1 }
0x10a3   : > { %v1337_v36 = vadd.f32 %v1541_v34, %v1336_v35  ;;  %v1569_v37 = vpop.f32.mrb[17].mxu1 }
0x10a4   : > { %v1339_v38 = vpop.f32.mrb[18].mxu1 }
0x10a5   : > { %v1342_v39 = vmax.f32 %v1337_v36, 0.0  ;;  %v1570_v40 = vpop.f32.mrb[19].mxu1 }
0x10a7   : > { %v1344_v41 = vpack.c.bf16 %v1342_v39, %v1342_v39 }
0x10a9   : > { %v1356_v42 = vsel %vm1351_vm5, %v1344_v41, 0 }
0x10aa   : > { %1572 = vmatpush3.bf16.xpose.msra.mxu0 %v1356_v42 }
0x10b1   : > { %1574 = vmatmul.mubr.msk.bf16.vlgmr.msra.gmra.mrb[20].mxu0 %vm1351_vm5, %v1343_v43 }
0x1184   : > { %v1392_v45 = vpop.f32.mrb[20].mxu0 }
0x1185   : > { %v1393_v46 = vadd.f32 %v1392_v45, %v1349_v44  ;;  %v1575_v47 = vpop.f32.mrb[21].mxu0 }
0x1186   : > { %v1395_v48 = vpop.f32.mrb[22].mxu0 }
0x1187   : > { %v1576_v49 = vpop.f32.mrb[23].mxu0  ;;  %v1399_v50 = vsel %vm1398_vm6, %v1393_v46, -inf }
0x1188   : > { %1400 = vmax.xlane.f32.xlu1 %v1399_v50 }
0x1215   : > { %v1401_v51 = vpop.xlane.xlu1 %1400 }
0x1216   : > { %v1402_v52 = vsub.f32 %v1393_v46, %v1401_v51 }
0x1218   : > { %v1403_v53 = vmul.f32 1.442695, %v1402_v52 }
0x121a   : > { %1753 = vpow2.f32 %v1403_v53 }
0x1224   : > { %v1754_v54 = vpop.eup %1753 }
0x1225   : > { %v1405_v55 = vsel %vm1398_vm6, %v1754_v54, 0.0 }
0x1226   : > { %1406 = vadd.xlane.f32.xlu0 %v1405_v55 }
0x12b3   : > { %v1407_v56 = vpop.xlane.xlu0 %1406 }
0x12b4   : > { %1755 = vlog2.f32 %v1407_v56 }
0x12be   : > { %v1756_v57 = vpop.eup %1755 }
0x12bf   : > { %v1409_v58 = vmul.f32 0.6931472, %v1756_v57 }
0x12c1   : > { %v1410_v59 = vsub.f32 %v1402_v52, %v1409_v58 }
0x12c3   : > { %1411 = vst.msk [vmem:[%s311_s17] sm:$0x3] %vm1398_vm6, %v1410_v59 }
0x12c4   : > { %1798 = shalt.err (!%p1795_p7)
}
0x12c5   : > { %s1799_s21 = scalar_lea.hbm %s2207_s26, 32  ;;  %s1803_s20 = scalar_lea.hbm %s2258_s8, 64 }
0x12c6   : > { %p1800_p8 = scmp.ne.s32.totalorder %s2207_s26, %s1799_s21  ;;  %p1804_p1 = scmp.lt.u32.totalorder %s2207_s26, %s2258_s8 }
0x12c7   : > { %p1805_p0 = scmp.lt.u32.totalorder %s1803_s20, %s1799_s21  ;;  %p1807_p6 = scmp.lt.u32.totalorder %s1799_s21, %s2207_s26 }
0x12c8   : > { %p1801_p11 = pnand %p1800_p8, %p2269_p9 }
0x12c9   : > { %p1806_p5 = por %p1805_p0, %p1804_p1 }
0x12ca   : > { %p1802_p13 = pneg %p1801_p11 }
0x12cb   : > { %p1808_p10 = por %p1807_p6, %p1806_p5 }
0x12cd   : > { %p1809_p12 = pnand %p1808_p10, %p1802_p13 }
0x12cf   : > { %1812 = shalt.err (!%p1809_p12)
}
0x12d0   : > { %1581 = dma.vmem_to_hbm [thread:$0]  (%p2269_p9), %s2209_s24, 32, %s2207_s26, %s1413_s10  }
0x12d1 PF: > { %p1593_p2 = scmp.ge.s32.totalorder %s1851_s30, 2  ;;  %s1438_s25 = sand.u32 1, %s1839_s27  }
0x12d2   : > { %p2270_p3 = scmp.ne.s32.totalorder %s2263_s16, 0  ;;  %s1439_s12 = scalar_lea.sflag [#allocation6], %s1438_s25 }
0x12d4   : > { %p1588_p4 = pnand %p1593_p2, %p2270_p3 }
0x12d6   : > { %1834 = dma.done.wait (!%p1588_p4), %s1439_s12, 32  }
0x12d7   : > { %1836 = vsyncadd (!%p1588_p4), %s1439_s12, 4294967264  ;;  %p19_p7 = scmp.ge.s32.totalorder %s1932_s11, 4   ;;  %s2271_s27 = smov %s1843_s28 }
0x12d8   : > { %s2272_s28 = smov %s1847_s29  ;;  %s2273_s29 = smov %s1943_s14 }
0x12d9   : > { %s2274_s30 = smov %s1932_s11  ;;  %21 = sbr.rel (!%p19_p7) target bundleno = 4 (0x4), region = 99 }
0x12e0   :  { %1444 = vsyncpa [#allocation5], 1 }
0x12e1   :  { %1446 = vsyncpa [#allocation5 + $0x1], 1 }
0x12e2   :  { %1447 = vsyncpa [#allocation6], 1 }
0x12e3   :  { %1449 = vsyncpa [#allocation6 + $0x1], 1 }

</bundles_post_ra>
